<compile_context>
chip_gen: v7x
topology: tpu7x:2x2x1
jax: 0.10.0
libtpu: 0.0.40
codegen_flags: <defaults>
</compile_context>

<pallas_src>
import functools

import jax
import jax.numpy as jnp
from jax import lax
from jax.experimental import pallas as pl
from jax.experimental.pallas import tpu as pltpu

_SUBLANE = 8  # f32 sublane tile


def _round_up(n, m):
    return (n + m - 1) // m * m


# ----------------------------------------------------------------------------
# Fused Inception kernel (one batch image per grid step)
# ----------------------------------------------------------------------------
def _inception_kernel(hh_ref, ww_ref, x_ref,
                      w1_ref, b1_ref, w22_ref, b22_ref,
                      w32_ref, b32_ref, w4_ref, b4_ref,
                      out_ref, *, H, W, c1, c1p, c2_0p, c2_1, c3_0p, c3_1, c4):
    """Fused Inception block.

    x_ref   : (1, Cin, H*W)  f32   spatial flattened onto the lane axis
    out_ref : (1, Ctot, H*W) f32   channel-concatenated NCHW output
    weights : packed 2-D matmul operands (bf16), biases (Cout_padded, 1) f32
    hh/ww   : (1, H*W) int32       row / col index of each flattened position
    """
    HW = H * W
    x = x_ref[0]                       # (Cin, HW) f32
    hh = hh_ref[...]                   # (1, HW) int32
    ww = ww_ref[...]                   # (1, HW) int32

    # Boundary-validity masks, computed once per unique (dh, dw) offset and
    # shared by the 3x3 conv, the 5x5 conv and the 3x3 max-pool.
    valid_h = {dh: (hh + dh >= 0) & (hh + dh < H) for dh in range(-2, 3)}
    valid_w = {dw: (ww + dw >= 0) & (ww + dw < W) for dw in range(-2, 3)}
    valid = {(dh, dw): valid_h[dh] & valid_w[dw]
             for dh in range(-2, 3) for dw in range(-2, 3)}

    def shifted_taps(img, K, fill):
        """K x K stencil taps (stride 1, pad K//2) of img (C, HW) via lane rolls."""
        r = K // 2
        taps = []
        for kh in range(K):
            dh = kh - r
            for kw in range(K):
                dw = kw - r
                delta = dh * W + dw
                rolled = img if delta == 0 else pltpu.roll(
                    img, (-delta) % HW, axis=1)
                taps.append(jnp.where(valid[(dh, dw)], rolled, fill))
        return taps

    # ---- branches 1 / 2a / 3a: three 1x1 convs fused into one matmul -------
    s = jnp.dot(w1_ref[...], x.astype(jnp.bfloat16),
                preferred_element_type=jnp.float32)   # (c1p+c2_0p+c3_0p, HW)
    s = jnp.maximum(s + b1_ref[...], 0.0)
    o1 = s[0:c1]
    t2 = s[c1p:c1p + c2_0p]                           # sublane-tile aligned
    t3 = s[c1p + c2_0p:c1p + c2_0p + c3_0p]           # sublane-tile aligned

    # ---- branch 2: 3x3 conv as a single im2col matmul (K = 9 * c2_0p) ------
    p2 = jnp.concatenate(shifted_taps(t2, 3, 0.0), axis=0)   # (9*c2_0p, HW)
    o2 = jnp.dot(w22_ref[...], p2.astype(jnp.bfloat16),
                 preferred_element_type=jnp.float32)
    o2 = jnp.maximum(o2 + b22_ref[...], 0.0)

    # ---- branch 3: 5x5 conv as a single im2col matmul (K = 25 * c3_0p) -----
    p3 = jnp.concatenate(shifted_taps(t3, 5, 0.0), axis=0)   # (25*c3_0p, HW)
    o3 = jnp.dot(w32_ref[...], p3.astype(jnp.bfloat16),
                 preferred_element_type=jnp.float32)
    o3 = jnp.maximum(o3 + b32_ref[...], 0.0)

    # ---- branch 4: 3x3/s1/p1 max-pool (lane rolls) fused with 1x1 conv -----
    pool = shifted_taps(x, 3, float("-inf"))
    m = pool[0]
    for t in pool[1:]:
        m = jnp.maximum(m, t)
    o4 = jnp.dot(w4_ref[...], m.astype(jnp.bfloat16),
                 preferred_element_type=jnp.float32)
    o4 = jnp.maximum(o4 + b4_ref[...], 0.0)

    # ---- write each branch directly into its channel slice (NCHW concat) ---
    odt = out_ref.dtype
    out_ref[0, 0:c1, :] = o1.astype(odt)
    out_ref[0, c1:c1 + c2_1, :] = o2.astype(odt)
    out_ref[0, c1 + c2_1:c1 + c2_1 + c3_1, :] = o3.astype(odt)
    out_ref[0, c1 + c2_1 + c3_1:c1 + c2_1 + c3_1 + c4, :] = o4.astype(odt)


# ----------------------------------------------------------------------------
# Wrapper (NCHW in / NCHW out, matching the PyTorch module)
# ----------------------------------------------------------------------------
def inception_forward(x_nchw, params):
    N, Cin, H, W = x_nchw.shape
    HW = H * W

    w1, b1 = params["b1_1"]
    w21, b21 = params["b2_1"]
    w22, b22 = params["b2_2"]
    w31, b31 = params["b3_1"]
    w32, b32 = params["b3_2"]
    w42, b42 = params["b4_2"]
    c1, c2_0, c2_1 = w1.shape[0], w21.shape[0], w22.shape[0]
    c3_0, c3_1, c4 = w31.shape[0], w32.shape[0], w42.shape[0]
    Ctot = c1 + c2_1 + c3_1 + c4

    # Sublane-aligned (multiple-of-8) intermediate channel counts.
    c1p = _round_up(c1, _SUBLANE)
    c2_0p = _round_up(c2_0, _SUBLANE)
    c3_0p = _round_up(c3_0, _SUBLANE)

    def pad_rows(w2d, b, rows):
        w2d = jnp.pad(w2d, ((0, rows - w2d.shape[0]), (0, 0)))
        b = jnp.pad(b, (0, rows - b.shape[0]))
        return w2d, b

    # Fused (and row-padded) 1x1 weights / biases for branches 1, 2a, 3a.
    w1r, b1r = pad_rows(w1.reshape(c1, Cin), b1, c1p)
    w21r, b21r = pad_rows(w21.reshape(c2_0, Cin), b21, c2_0p)
    w31r, b31r = pad_rows(w31.reshape(c3_0, Cin), b31, c3_0p)
    w1all = jnp.concatenate([w1r, w21r, w31r], axis=0).astype(jnp.bfloat16)
    b1all = jnp.concatenate([b1r, b21r, b31r]).reshape(-1, 1).astype(jnp.float32)

    # im2col weight matrices with input-channel zero padding:
    # column index = (kh*KW + kw) * cin_padded + cin.
    def im2col_w(w, cin_p):
        co, ci, kh, kw = w.shape
        wp = jnp.pad(w, ((0, 0), (0, cin_p - ci), (0, 0), (0, 0)))
        return jnp.transpose(wp, (0, 2, 3, 1)).reshape(co, kh * kw * cin_p)

    w22m = im2col_w(w22, c2_0p).astype(jnp.bfloat16)
    w32m = im2col_w(w32, c3_0p).astype(jnp.bfloat16)
    w4m = w42.reshape(c4, Cin).astype(jnp.bfloat16)
    b22m = b22.reshape(-1, 1).astype(jnp.float32)
    b32m = b32.reshape(-1, 1).astype(jnp.float32)
    b4m = b42.reshape(-1, 1).astype(jnp.float32)

    # Flattened spatial coordinates (computed once, reused by every tap mask).
    pidx = jnp.arange(HW, dtype=jnp.int32).reshape(1, HW)
    hh = pidx // W
    ww = pidx % W

    x2 = x_nchw.reshape(N, Cin, HW).astype(jnp.float32)   # free reshape, no pad

    kernel = functools.partial(_inception_kernel, H=H, W=W, c1=c1, c1p=c1p,
                               c2_0p=c2_0p, c2_1=c2_1, c3_0p=c3_0p,
                               c3_1=c3_1, c4=c4)

    def full_spec(arr):
        zeros = (0,) * arr.ndim
        return pl.BlockSpec(arr.shape, lambda n: zeros)

    out = pl.pallas_call(
        kernel,
        out_shape=jax.ShapeDtypeStruct((N, Ctot, HW), jnp.float32),
        grid=(N,),
        in_specs=[
            full_spec(hh), full_spec(ww),
            pl.BlockSpec((1, Cin, HW), lambda n: (n, 0, 0)),
            full_spec(w1all), full_spec(b1all),
            full_spec(w22m), full_spec(b22m),
            full_spec(w32m), full_spec(b32m),
            full_spec(w4m), full_spec(b4m),
        ],
        out_specs=pl.BlockSpec((1, Ctot, HW), lambda n: (n, 0, 0)),
        compiler_params=pltpu.CompilerParams(
            dimension_semantics=("parallel",)),
    )(hh, ww, x2, w1all, b1all, w22m, b22m, w32m, b32m, w4m, b4m)

    # Output is already channel-concatenated NCHW; reshape is free.
    return out.reshape(N, Ctot, H, W)


# ----------------------------------------------------------------------------
# Parameter init (deterministic, mimics nn.Conv2d default uniform init)
# ----------------------------------------------------------------------------
def init_conv_params(key, in_c, out_c, kh, kw):
    k1, k2 = jax.random.split(key)
    fan_in = in_c * kh * kw
    bound = 1.0 / (fan_in ** 0.5)
    w = jax.random.uniform(k1, (out_c, in_c, kh, kw), jnp.float32, -bound, bound)
    b = jax.random.uniform(k2, (out_c,), jnp.float32, -bound, bound)
    return w, b


def init_inception_params(key, in_channel, c1, c2, c3, c4):
    keys = jax.random.split(key, 6)
    return {
        "b1_1": init_conv_params(keys[0], in_channel, c1, 1, 1),
        "b2_1": init_conv_params(keys[1], in_channel, c2[0], 1, 1),
        "b2_2": init_conv_params(keys[2], c2[0], c2[1], 3, 3),
        "b3_1": init_conv_params(keys[3], in_channel, c3[0], 1, 1),
        "b3_2": init_conv_params(keys[4], c3[0], c3[1], 5, 5),
        "b4_2": init_conv_params(keys[5], in_channel, c4, 1, 1),
    }


# ----------------------------------------------------------------------------
# Pure-JAX f32 reference (for correctness check)
# ----------------------------------------------------------------------------
def _ref_conv_relu(x_nchw, w, b, padding):
    y = lax.conv_general_dilated(
        x_nchw, w, window_strides=(1, 1),
        padding=[(padding[0], padding[0]), (padding[1], padding[1])],
        dimension_numbers=("NCHW", "OIHW", "NCHW"))
    return jnp.maximum(y + b[None, :, None, None], 0.0)


def _ref_maxpool(x_nchw):
    return lax.reduce_window(
        x_nchw, -jnp.inf, lax.max,
        window_dimensions=(1, 1, 3, 3), window_strides=(1, 1, 1, 1),
        padding=[(0, 0), (0, 0), (1, 1), (1, 1)])


def _ref_inception(x_nchw, p):
    o1 = _ref_conv_relu(x_nchw, *p["b1_1"], (0, 0))
    o2 = _ref_conv_relu(_ref_conv_relu(x_nchw, *p["b2_1"], (0, 0)), *p["b2_2"], (1, 1))
    o3 = _ref_conv_relu(_ref_conv_relu(x_nchw, *p["b3_1"], (0, 0)), *p["b3_2"], (2, 2))
    o4 = _ref_conv_relu(_ref_maxpool(x_nchw), *p["b4_2"], (0, 0))
    return jnp.concatenate([o1, o2, o3, o4], axis=1)


# ----------------------------------------------------------------------------
if __name__ == "__main__":
    key = jax.random.PRNGKey(0)
    kx, kp = jax.random.split(key)

    # Small shapes: batch=2, in_channel=4, spatial 16x16.
    in_channel, c1, c2, c3, c4 = 4, 8, (4, 8), (4, 8), 8
    x = jax.random.normal(kx, (2, in_channel, 16, 16), jnp.float32)  # NCHW
    params = init_inception_params(kp, in_channel, c1, c2, c3, c4)

    fwd = jax.jit(inception_forward)
    out = jax.block_until_ready(fwd(x, params))
    ref = jax.block_until_ready(_ref_inception(x, params))

    assert out.shape == (2, c1 + c2[1] + c3[1] + c4, 16, 16), out.shape
    # bf16 MXU operands (f32 accumulation) -> loosened tolerance vs f32 reference.
    err = float(jnp.max(jnp.abs(out - ref)))
    assert jnp.allclose(out, ref, rtol=3e-2, atol=3e-2), err

    print("KERNEL_OK")
</pallas_src>

<mosaic_0001>
module attributes {stable_mosaic.version = 11 : i64} {
  func.func @_inception_kernel(%arg0: i32, %arg1: memref<1x256xi32, #tpu.memory_space<vmem>>, %arg2: memref<1x256xi32, #tpu.memory_space<vmem>>, %arg3: memref<1x4x256xf32, #tpu.memory_space<vmem>>, %arg4: memref<24x4xbf16, #tpu.memory_space<vmem>>, %arg5: memref<24x1xf32, #tpu.memory_space<vmem>>, %arg6: memref<8x72xbf16, #tpu.memory_space<vmem>>, %arg7: memref<8x1xf32, #tpu.memory_space<vmem>>, %arg8: memref<8x200xbf16, #tpu.memory_space<vmem>>, %arg9: memref<8x1xf32, #tpu.memory_space<vmem>>, %arg10: memref<8x4xbf16, #tpu.memory_space<vmem>>, %arg11: memref<8x1xf32, #tpu.memory_space<vmem>>, %arg12: memref<1x32x256xf32, #tpu.memory_space<vmem>>) attributes {dimension_semantics = [#tpu.dimension_semantics<parallel>], iteration_bounds = array<i64: 2>, scalar_prefetch = 0 : i64, scratch_operands = 0 : i64, tpu.core_type = #tpu.core_type<tc>, window_params = [{pipeline_mode = #tpu.pipeline_mode<synchronous>, transform_indices = @transform_0, window_bounds = array<i64: 1, 256>}, {pipeline_mode = #tpu.pipeline_mode<synchronous>, transform_indices = @transform_1, window_bounds = array<i64: 1, 256>}, {transform_indices = @transform_2, window_bounds = array<i64: 1, 4, 256>}, {pipeline_mode = #tpu.pipeline_mode<synchronous>, transform_indices = @transform_3, window_bounds = array<i64: 24, 4>}, {pipeline_mode = #tpu.pipeline_mode<synchronous>, transform_indices = @transform_4, window_bounds = array<i64: 24, 1>}, {pipeline_mode = #tpu.pipeline_mode<synchronous>, transform_indices = @transform_5, window_bounds = array<i64: 8, 72>}, {pipeline_mode = #tpu.pipeline_mode<synchronous>, transform_indices = @transform_6, window_bounds = array<i64: 8, 1>}, {pipeline_mode = #tpu.pipeline_mode<synchronous>, transform_indices = @transform_7, window_bounds = array<i64: 8, 200>}, {pipeline_mode = #tpu.pipeline_mode<synchronous>, transform_indices = @transform_8, window_bounds = array<i64: 8, 1>}, {pipeline_mode = #tpu.pipeline_mode<synchronous>, transform_indices = @transform_9, window_bounds = array<i64: 8, 4>}, {pipeline_mode = #tpu.pipeline_mode<synchronous>, transform_indices = @transform_10, window_bounds = array<i64: 8, 1>}, {transform_indices = @transform_11, window_bounds = array<i64: 1, 32, 256>}]} {
    %c0 = arith.constant 0 : index
    %c0_0 = arith.constant 0 : index
    %c0_1 = arith.constant 0 : index
    %0 = vector.load %arg3[%c0, %c0_0, %c0_1] : memref<1x4x256xf32, #tpu.memory_space<vmem>>, vector<1x4x256xf32>
    %1 = vector.shape_cast %0 : vector<1x4x256xf32> to vector<4x256xf32>
    %c0_2 = arith.constant 0 : index
    %c0_3 = arith.constant 0 : index
    %2 = vector.load %arg1[%c0_2, %c0_3] : memref<1x256xi32, #tpu.memory_space<vmem>>, vector<1x256xi32>
    %c0_4 = arith.constant 0 : index
    %c0_5 = arith.constant 0 : index
    %3 = vector.load %arg2[%c0_4, %c0_5] : memref<1x256xi32, #tpu.memory_space<vmem>>, vector<1x256xi32>
    %c-2_i32 = arith.constant -2 : i32
    %4 = vector.broadcast %c-2_i32 : i32 to vector<1x256xi32>
    %5 = arith.addi %2, %4 : vector<1x256xi32>
    %c0_i32 = arith.constant 0 : i32
    %6 = vector.broadcast %c0_i32 : i32 to vector<1x256xi32>
    %7 = arith.cmpi sge, %5, %6 : vector<1x256xi32>
    %c-2_i32_6 = arith.constant -2 : i32
    %8 = vector.broadcast %c-2_i32_6 : i32 to vector<1x256xi32>
    %9 = arith.addi %2, %8 : vector<1x256xi32>
    %c16_i32 = arith.constant 16 : i32
    %10 = vector.broadcast %c16_i32 : i32 to vector<1x256xi32>
    %11 = arith.cmpi slt, %9, %10 : vector<1x256xi32>
    %12 = arith.andi %7, %11 : vector<1x256xi1>
    %c-1_i32 = arith.constant -1 : i32
    %13 = vector.broadcast %c-1_i32 : i32 to vector<1x256xi32>
    %14 = arith.addi %2, %13 : vector<1x256xi32>
    %c0_i32_7 = arith.constant 0 : i32
    %15 = vector.broadcast %c0_i32_7 : i32 to vector<1x256xi32>
    %16 = arith.cmpi sge, %14, %15 : vector<1x256xi32>
    %c-1_i32_8 = arith.constant -1 : i32
    %17 = vector.broadcast %c-1_i32_8 : i32 to vector<1x256xi32>
    %18 = arith.addi %2, %17 : vector<1x256xi32>
    %c16_i32_9 = arith.constant 16 : i32
    %19 = vector.broadcast %c16_i32_9 : i32 to vector<1x256xi32>
    %20 = arith.cmpi slt, %18, %19 : vector<1x256xi32>
    %21 = arith.andi %16, %20 : vector<1x256xi1>
    %c0_i32_10 = arith.constant 0 : i32
    %22 = vector.broadcast %c0_i32_10 : i32 to vector<1x256xi32>
    %23 = arith.addi %2, %22 : vector<1x256xi32>
    %c0_i32_11 = arith.constant 0 : i32
    %24 = vector.broadcast %c0_i32_11 : i32 to vector<1x256xi32>
    %25 = arith.cmpi sge, %23, %24 : vector<1x256xi32>
    %c0_i32_12 = arith.constant 0 : i32
    %26 = vector.broadcast %c0_i32_12 : i32 to vector<1x256xi32>
    %27 = arith.addi %2, %26 : vector<1x256xi32>
    %c16_i32_13 = arith.constant 16 : i32
    %28 = vector.broadcast %c16_i32_13 : i32 to vector<1x256xi32>
    %29 = arith.cmpi slt, %27, %28 : vector<1x256xi32>
    %30 = arith.andi %25, %29 : vector<1x256xi1>
    %c1_i32 = arith.constant 1 : i32
    %31 = vector.broadcast %c1_i32 : i32 to vector<1x256xi32>
    %32 = arith.addi %2, %31 : vector<1x256xi32>
    %c0_i32_14 = arith.constant 0 : i32
    %33 = vector.broadcast %c0_i32_14 : i32 to vector<1x256xi32>
    %34 = arith.cmpi sge, %32, %33 : vector<1x256xi32>
    %c1_i32_15 = arith.constant 1 : i32
    %35 = vector.broadcast %c1_i32_15 : i32 to vector<1x256xi32>
    %36 = arith.addi %2, %35 : vector<1x256xi32>
    %c16_i32_16 = arith.constant 16 : i32
    %37 = vector.broadcast %c16_i32_16 : i32 to vector<1x256xi32>
    %38 = arith.cmpi slt, %36, %37 : vector<1x256xi32>
    %39 = arith.andi %34, %38 : vector<1x256xi1>
    %c2_i32 = arith.constant 2 : i32
    %40 = vector.broadcast %c2_i32 : i32 to vector<1x256xi32>
    %41 = arith.addi %2, %40 : vector<1x256xi32>
    %c0_i32_17 = arith.constant 0 : i32
    %42 = vector.broadcast %c0_i32_17 : i32 to vector<1x256xi32>
    %43 = arith.cmpi sge, %41, %42 : vector<1x256xi32>
    %c2_i32_18 = arith.constant 2 : i32
    %44 = vector.broadcast %c2_i32_18 : i32 to vector<1x256xi32>
    %45 = arith.addi %2, %44 : vector<1x256xi32>
    %c16_i32_19 = arith.constant 16 : i32
    %46 = vector.broadcast %c16_i32_19 : i32 to vector<1x256xi32>
    %47 = arith.cmpi slt, %45, %46 : vector<1x256xi32>
    %48 = arith.andi %43, %47 : vector<1x256xi1>
    %c-2_i32_20 = arith.constant -2 : i32
    %49 = vector.broadcast %c-2_i32_20 : i32 to vector<1x256xi32>
    %50 = arith.addi %3, %49 : vector<1x256xi32>
    %c0_i32_21 = arith.constant 0 : i32
    %51 = vector.broadcast %c0_i32_21 : i32 to vector<1x256xi32>
    %52 = arith.cmpi sge, %50, %51 : vector<1x256xi32>
    %c-2_i32_22 = arith.constant -2 : i32
    %53 = vector.broadcast %c-2_i32_22 : i32 to vector<1x256xi32>
    %54 = arith.addi %3, %53 : vector<1x256xi32>
    %c16_i32_23 = arith.constant 16 : i32
    %55 = vector.broadcast %c16_i32_23 : i32 to vector<1x256xi32>
    %56 = arith.cmpi slt, %54, %55 : vector<1x256xi32>
    %57 = arith.andi %52, %56 : vector<1x256xi1>
    %c-1_i32_24 = arith.constant -1 : i32
    %58 = vector.broadcast %c-1_i32_24 : i32 to vector<1x256xi32>
    %59 = arith.addi %3, %58 : vector<1x256xi32>
    %c0_i32_25 = arith.constant 0 : i32
    %60 = vector.broadcast %c0_i32_25 : i32 to vector<1x256xi32>
    %61 = arith.cmpi sge, %59, %60 : vector<1x256xi32>
    %c-1_i32_26 = arith.constant -1 : i32
    %62 = vector.broadcast %c-1_i32_26 : i32 to vector<1x256xi32>
    %63 = arith.addi %3, %62 : vector<1x256xi32>
    %c16_i32_27 = arith.constant 16 : i32
    %64 = vector.broadcast %c16_i32_27 : i32 to vector<1x256xi32>
    %65 = arith.cmpi slt, %63, %64 : vector<1x256xi32>
    %66 = arith.andi %61, %65 : vector<1x256xi1>
    %c0_i32_28 = arith.constant 0 : i32
    %67 = vector.broadcast %c0_i32_28 : i32 to vector<1x256xi32>
    %68 = arith.addi %3, %67 : vector<1x256xi32>
    %c0_i32_29 = arith.constant 0 : i32
    %69 = vector.broadcast %c0_i32_29 : i32 to vector<1x256xi32>
    %70 = arith.cmpi sge, %68, %69 : vector<1x256xi32>
    %c0_i32_30 = arith.constant 0 : i32
    %71 = vector.broadcast %c0_i32_30 : i32 to vector<1x256xi32>
    %72 = arith.addi %3, %71 : vector<1x256xi32>
    %c16_i32_31 = arith.constant 16 : i32
    %73 = vector.broadcast %c16_i32_31 : i32 to vector<1x256xi32>
    %74 = arith.cmpi slt, %72, %73 : vector<1x256xi32>
    %75 = arith.andi %70, %74 : vector<1x256xi1>
    %c1_i32_32 = arith.constant 1 : i32
    %76 = vector.broadcast %c1_i32_32 : i32 to vector<1x256xi32>
    %77 = arith.addi %3, %76 : vector<1x256xi32>
    %c0_i32_33 = arith.constant 0 : i32
    %78 = vector.broadcast %c0_i32_33 : i32 to vector<1x256xi32>
    %79 = arith.cmpi sge, %77, %78 : vector<1x256xi32>
    %c1_i32_34 = arith.constant 1 : i32
    %80 = vector.broadcast %c1_i32_34 : i32 to vector<1x256xi32>
    %81 = arith.addi %3, %80 : vector<1x256xi32>
    %c16_i32_35 = arith.constant 16 : i32
    %82 = vector.broadcast %c16_i32_35 : i32 to vector<1x256xi32>
    %83 = arith.cmpi slt, %81, %82 : vector<1x256xi32>
    %84 = arith.andi %79, %83 : vector<1x256xi1>
    %c2_i32_36 = arith.constant 2 : i32
    %85 = vector.broadcast %c2_i32_36 : i32 to vector<1x256xi32>
    %86 = arith.addi %3, %85 : vector<1x256xi32>
    %c0_i32_37 = arith.constant 0 : i32
    %87 = vector.broadcast %c0_i32_37 : i32 to vector<1x256xi32>
    %88 = arith.cmpi sge, %86, %87 : vector<1x256xi32>
    %c2_i32_38 = arith.constant 2 : i32
    %89 = vector.broadcast %c2_i32_38 : i32 to vector<1x256xi32>
    %90 = arith.addi %3, %89 : vector<1x256xi32>
    %c16_i32_39 = arith.constant 16 : i32
    %91 = vector.broadcast %c16_i32_39 : i32 to vector<1x256xi32>
    %92 = arith.cmpi slt, %90, %91 : vector<1x256xi32>
    %93 = arith.andi %88, %92 : vector<1x256xi1>
    %94 = arith.andi %12, %57 : vector<1x256xi1>
    %95 = arith.andi %12, %66 : vector<1x256xi1>
    %96 = arith.andi %12, %75 : vector<1x256xi1>
    %97 = arith.andi %12, %84 : vector<1x256xi1>
    %98 = arith.andi %12, %93 : vector<1x256xi1>
    %99 = arith.andi %21, %57 : vector<1x256xi1>
    %100 = arith.andi %21, %66 : vector<1x256xi1>
    %101 = arith.andi %21, %75 : vector<1x256xi1>
    %102 = arith.andi %21, %84 : vector<1x256xi1>
    %103 = arith.andi %21, %93 : vector<1x256xi1>
    %104 = arith.andi %30, %57 : vector<1x256xi1>
    %105 = arith.andi %30, %66 : vector<1x256xi1>
    %106 = arith.andi %30, %75 : vector<1x256xi1>
    %107 = arith.andi %30, %84 : vector<1x256xi1>
    %108 = arith.andi %30, %93 : vector<1x256xi1>
    %109 = arith.andi %39, %57 : vector<1x256xi1>
    %110 = arith.andi %39, %66 : vector<1x256xi1>
    %111 = arith.andi %39, %75 : vector<1x256xi1>
    %112 = arith.andi %39, %84 : vector<1x256xi1>
    %113 = arith.andi %39, %93 : vector<1x256xi1>
    %114 = arith.andi %48, %57 : vector<1x256xi1>
    %115 = arith.andi %48, %66 : vector<1x256xi1>
    %116 = arith.andi %48, %75 : vector<1x256xi1>
    %117 = arith.andi %48, %84 : vector<1x256xi1>
    %118 = arith.andi %48, %93 : vector<1x256xi1>
    %c0_40 = arith.constant 0 : index
    %c0_41 = arith.constant 0 : index
    %119 = vector.load %arg4[%c0_40, %c0_41] : memref<24x4xbf16, #tpu.memory_space<vmem>>, vector<24x4xbf16>
    %120 = arith.truncf %1 : vector<4x256xf32> to vector<4x256xbf16>
    %cst = arith.constant dense<0.000000e+00> : vector<24x256xf32>
    %121 = tpu.matmul %119, %120, %cst {dimension_numbers = #tpu.dot_dimension_numbers<[1], [0], [0], [1], [0, 0, 1, 1], [], []>} : vector<24x4xbf16>, vector<4x256xbf16>, vector<24x256xf32> -> vector<24x256xf32>
    %c0_42 = arith.constant 0 : index
    %c0_43 = arith.constant 0 : index
    %122 = vector.load %arg5[%c0_42, %c0_43] : memref<24x1xf32, #tpu.memory_space<vmem>>, vector<24x1xf32>
    %123 = vector.broadcast %122 : vector<24x1xf32> to vector<24x256xf32>
    %124 = arith.addf %121, %123 : vector<24x256xf32>
    %cst_44 = arith.constant 0.000000e+00 : f32
    %125 = vector.broadcast %cst_44 : f32 to vector<24x256xf32>
    %126 = arith.maximumf %124, %125 : vector<24x256xf32>
    %127 = vector.extract_strided_slice %126 {offsets = [0, 0], sizes = [8, 256], strides = [1, 1]} : vector<24x256xf32> to vector<8x256xf32>
    %128 = vector.extract_strided_slice %126 {offsets = [8, 0], sizes = [8, 256], strides = [1, 1]} : vector<24x256xf32> to vector<8x256xf32>
    %129 = vector.extract_strided_slice %126 {offsets = [16, 0], sizes = [8, 256], strides = [1, 1]} : vector<24x256xf32> to vector<8x256xf32>
    %c17_i32 = arith.constant 17 : i32
    %130 = tpu.dynamic_rotate %128 by %c17_i32 dim 1 : vector<8x256xf32>, i32 -> vector<8x256xf32>
    %cst_45 = arith.constant 0.000000e+00 : f32
    %131 = vector.shape_cast %100 : vector<1x256xi1> to vector<1x256xi1>
    %132 = vector.broadcast %131 : vector<1x256xi1> to vector<8x256xi1>
    %133 = vector.broadcast %cst_45 : f32 to vector<8x256xf32>
    %134 = arith.select %132, %130, %133 : vector<8x256xi1>, vector<8x256xf32>
    %c16_i32_46 = arith.constant 16 : i32
    %135 = tpu.dynamic_rotate %128 by %c16_i32_46 dim 1 : vector<8x256xf32>, i32 -> vector<8x256xf32>
    %cst_47 = arith.constant 0.000000e+00 : f32
    %136 = vector.shape_cast %101 : vector<1x256xi1> to vector<1x256xi1>
    %137 = vector.broadcast %136 : vector<1x256xi1> to vector<8x256xi1>
    %138 = vector.broadcast %cst_47 : f32 to vector<8x256xf32>
    %139 = arith.select %137, %135, %138 : vector<8x256xi1>, vector<8x256xf32>
    %c15_i32 = arith.constant 15 : i32
    %140 = tpu.dynamic_rotate %128 by %c15_i32 dim 1 : vector<8x256xf32>, i32 -> vector<8x256xf32>
    %cst_48 = arith.constant 0.000000e+00 : f32
    %141 = vector.shape_cast %102 : vector<1x256xi1> to vector<1x256xi1>
    %142 = vector.broadcast %141 : vector<1x256xi1> to vector<8x256xi1>
    %143 = vector.broadcast %cst_48 : f32 to vector<8x256xf32>
    %144 = arith.select %142, %140, %143 : vector<8x256xi1>, vector<8x256xf32>
    %c1_i32_49 = arith.constant 1 : i32
    %145 = tpu.dynamic_rotate %128 by %c1_i32_49 dim 1 : vector<8x256xf32>, i32 -> vector<8x256xf32>
    %cst_50 = arith.constant 0.000000e+00 : f32
    %146 = vector.shape_cast %105 : vector<1x256xi1> to vector<1x256xi1>
    %147 = vector.broadcast %146 : vector<1x256xi1> to vector<8x256xi1>
    %148 = vector.broadcast %cst_50 : f32 to vector<8x256xf32>
    %149 = arith.select %147, %145, %148 : vector<8x256xi1>, vector<8x256xf32>
    %cst_51 = arith.constant 0.000000e+00 : f32
    %150 = vector.shape_cast %106 : vector<1x256xi1> to vector<1x256xi1>
    %151 = vector.broadcast %150 : vector<1x256xi1> to vector<8x256xi1>
    %152 = vector.broadcast %cst_51 : f32 to vector<8x256xf32>
    %153 = arith.select %151, %128, %152 : vector<8x256xi1>, vector<8x256xf32>
    %c255_i32 = arith.constant 255 : i32
    %154 = tpu.dynamic_rotate %128 by %c255_i32 dim 1 : vector<8x256xf32>, i32 -> vector<8x256xf32>
    %cst_52 = arith.constant 0.000000e+00 : f32
    %155 = vector.shape_cast %107 : vector<1x256xi1> to vector<1x256xi1>
    %156 = vector.broadcast %155 : vector<1x256xi1> to vector<8x256xi1>
    %157 = vector.broadcast %cst_52 : f32 to vector<8x256xf32>
    %158 = arith.select %156, %154, %157 : vector<8x256xi1>, vector<8x256xf32>
    %c241_i32 = arith.constant 241 : i32
    %159 = tpu.dynamic_rotate %128 by %c241_i32 dim 1 : vector<8x256xf32>, i32 -> vector<8x256xf32>
    %cst_53 = arith.constant 0.000000e+00 : f32
    %160 = vector.shape_cast %110 : vector<1x256xi1> to vector<1x256xi1>
    %161 = vector.broadcast %160 : vector<1x256xi1> to vector<8x256xi1>
    %162 = vector.broadcast %cst_53 : f32 to vector<8x256xf32>
    %163 = arith.select %161, %159, %162 : vector<8x256xi1>, vector<8x256xf32>
    %c240_i32 = arith.constant 240 : i32
    %164 = tpu.dynamic_rotate %128 by %c240_i32 dim 1 : vector<8x256xf32>, i32 -> vector<8x256xf32>
    %cst_54 = arith.constant 0.000000e+00 : f32
    %165 = vector.shape_cast %111 : vector<1x256xi1> to vector<1x256xi1>
    %166 = vector.broadcast %165 : vector<1x256xi1> to vector<8x256xi1>
    %167 = vector.broadcast %cst_54 : f32 to vector<8x256xf32>
    %168 = arith.select %166, %164, %167 : vector<8x256xi1>, vector<8x256xf32>
    %c239_i32 = arith.constant 239 : i32
    %169 = tpu.dynamic_rotate %128 by %c239_i32 dim 1 : vector<8x256xf32>, i32 -> vector<8x256xf32>
    %cst_55 = arith.constant 0.000000e+00 : f32
    %170 = vector.shape_cast %112 : vector<1x256xi1> to vector<1x256xi1>
    %171 = vector.broadcast %170 : vector<1x256xi1> to vector<8x256xi1>
    %172 = vector.broadcast %cst_55 : f32 to vector<8x256xf32>
    %173 = arith.select %171, %169, %172 : vector<8x256xi1>, vector<8x256xf32>
    %174 = tpu.concatenate %134, %139, %144, %149, %153, %158, %163, %168, %173 in 0 : vector<8x256xf32>, vector<8x256xf32>, vector<8x256xf32>, vector<8x256xf32>, vector<8x256xf32>, vector<8x256xf32>, vector<8x256xf32>, vector<8x256xf32>, vector<8x256xf32> -> vector<72x256xf32>
    %c0_56 = arith.constant 0 : index
    %c0_57 = arith.constant 0 : index
    %175 = vector.load %arg6[%c0_56, %c0_57] : memref<8x72xbf16, #tpu.memory_space<vmem>>, vector<8x72xbf16>
    %176 = arith.truncf %174 : vector<72x256xf32> to vector<72x256xbf16>
    %cst_58 = arith.constant dense<0.000000e+00> : vector<8x256xf32>
    %177 = tpu.matmul %175, %176, %cst_58 {dimension_numbers = #tpu.dot_dimension_numbers<[1], [0], [0], [1], [0, 0, 1, 1], [], []>} : vector<8x72xbf16>, vector<72x256xbf16>, vector<8x256xf32> -> vector<8x256xf32>
    %c0_59 = arith.constant 0 : index
    %c0_60 = arith.constant 0 : index
    %178 = vector.load %arg7[%c0_59, %c0_60] : memref<8x1xf32, #tpu.memory_space<vmem>>, vector<8x1xf32>
    %179 = vector.broadcast %178 : vector<8x1xf32> to vector<8x256xf32>
    %180 = arith.addf %177, %179 : vector<8x256xf32>
    %cst_61 = arith.constant 0.000000e+00 : f32
    %181 = vector.broadcast %cst_61 : f32 to vector<8x256xf32>
    %182 = arith.maximumf %180, %181 : vector<8x256xf32>
    %c34_i32 = arith.constant 34 : i32
    %183 = tpu.dynamic_rotate %129 by %c34_i32 dim 1 : vector<8x256xf32>, i32 -> vector<8x256xf32>
    %cst_62 = arith.constant 0.000000e+00 : f32
    %184 = vector.shape_cast %94 : vector<1x256xi1> to vector<1x256xi1>
    %185 = vector.broadcast %184 : vector<1x256xi1> to vector<8x256xi1>
    %186 = vector.broadcast %cst_62 : f32 to vector<8x256xf32>
    %187 = arith.select %185, %183, %186 : vector<8x256xi1>, vector<8x256xf32>
    %c33_i32 = arith.constant 33 : i32
    %188 = tpu.dynamic_rotate %129 by %c33_i32 dim 1 : vector<8x256xf32>, i32 -> vector<8x256xf32>
    %cst_63 = arith.constant 0.000000e+00 : f32
    %189 = vector.shape_cast %95 : vector<1x256xi1> to vector<1x256xi1>
    %190 = vector.broadcast %189 : vector<1x256xi1> to vector<8x256xi1>
    %191 = vector.broadcast %cst_63 : f32 to vector<8x256xf32>
    %192 = arith.select %190, %188, %191 : vector<8x256xi1>, vector<8x256xf32>
    %c32_i32 = arith.constant 32 : i32
    %193 = tpu.dynamic_rotate %129 by %c32_i32 dim 1 : vector<8x256xf32>, i32 -> vector<8x256xf32>
    %cst_64 = arith.constant 0.000000e+00 : f32
    %194 = vector.shape_cast %96 : vector<1x256xi1> to vector<1x256xi1>
    %195 = vector.broadcast %194 : vector<1x256xi1> to vector<8x256xi1>
    %196 = vector.broadcast %cst_64 : f32 to vector<8x256xf32>
    %197 = arith.select %195, %193, %196 : vector<8x256xi1>, vector<8x256xf32>
    %c31_i32 = arith.constant 31 : i32
    %198 = tpu.dynamic_rotate %129 by %c31_i32 dim 1 : vector<8x256xf32>, i32 -> vector<8x256xf32>
    %cst_65 = arith.constant 0.000000e+00 : f32
    %199 = vector.shape_cast %97 : vector<1x256xi1> to vector<1x256xi1>
    %200 = vector.broadcast %199 : vector<1x256xi1> to vector<8x256xi1>
    %201 = vector.broadcast %cst_65 : f32 to vector<8x256xf32>
    %202 = arith.select %200, %198, %201 : vector<8x256xi1>, vector<8x256xf32>
    %c30_i32 = arith.constant 30 : i32
    %203 = tpu.dynamic_rotate %129 by %c30_i32 dim 1 : vector<8x256xf32>, i32 -> vector<8x256xf32>
    %cst_66 = arith.constant 0.000000e+00 : f32
    %204 = vector.shape_cast %98 : vector<1x256xi1> to vector<1x256xi1>
    %205 = vector.broadcast %204 : vector<1x256xi1> to vector<8x256xi1>
    %206 = vector.broadcast %cst_66 : f32 to vector<8x256xf32>
    %207 = arith.select %205, %203, %206 : vector<8x256xi1>, vector<8x256xf32>
    %c18_i32 = arith.constant 18 : i32
    %208 = tpu.dynamic_rotate %129 by %c18_i32 dim 1 : vector<8x256xf32>, i32 -> vector<8x256xf32>
    %cst_67 = arith.constant 0.000000e+00 : f32
    %209 = vector.shape_cast %99 : vector<1x256xi1> to vector<1x256xi1>
    %210 = vector.broadcast %209 : vector<1x256xi1> to vector<8x256xi1>
    %211 = vector.broadcast %cst_67 : f32 to vector<8x256xf32>
    %212 = arith.select %210, %208, %211 : vector<8x256xi1>, vector<8x256xf32>
    %c17_i32_68 = arith.constant 17 : i32
    %213 = tpu.dynamic_rotate %129 by %c17_i32_68 dim 1 : vector<8x256xf32>, i32 -> vector<8x256xf32>
    %cst_69 = arith.constant 0.000000e+00 : f32
    %214 = vector.shape_cast %100 : vector<1x256xi1> to vector<1x256xi1>
    %215 = vector.broadcast %214 : vector<1x256xi1> to vector<8x256xi1>
    %216 = vector.broadcast %cst_69 : f32 to vector<8x256xf32>
    %217 = arith.select %215, %213, %216 : vector<8x256xi1>, vector<8x256xf32>
    %c16_i32_70 = arith.constant 16 : i32
    %218 = tpu.dynamic_rotate %129 by %c16_i32_70 dim 1 : vector<8x256xf32>, i32 -> vector<8x256xf32>
    %cst_71 = arith.constant 0.000000e+00 : f32
    %219 = vector.shape_cast %101 : vector<1x256xi1> to vector<1x256xi1>
    %220 = vector.broadcast %219 : vector<1x256xi1> to vector<8x256xi1>
    %221 = vector.broadcast %cst_71 : f32 to vector<8x256xf32>
    %222 = arith.select %220, %218, %221 : vector<8x256xi1>, vector<8x256xf32>
    %c15_i32_72 = arith.constant 15 : i32
    %223 = tpu.dynamic_rotate %129 by %c15_i32_72 dim 1 : vector<8x256xf32>, i32 -> vector<8x256xf32>
    %cst_73 = arith.constant 0.000000e+00 : f32
    %224 = vector.shape_cast %102 : vector<1x256xi1> to vector<1x256xi1>
    %225 = vector.broadcast %224 : vector<1x256xi1> to vector<8x256xi1>
    %226 = vector.broadcast %cst_73 : f32 to vector<8x256xf32>
    %227 = arith.select %225, %223, %226 : vector<8x256xi1>, vector<8x256xf32>
    %c14_i32 = arith.constant 14 : i32
    %228 = tpu.dynamic_rotate %129 by %c14_i32 dim 1 : vector<8x256xf32>, i32 -> vector<8x256xf32>
    %cst_74 = arith.constant 0.000000e+00 : f32
    %229 = vector.shape_cast %103 : vector<1x256xi1> to vector<1x256xi1>
    %230 = vector.broadcast %229 : vector<1x256xi1> to vector<8x256xi1>
    %231 = vector.broadcast %cst_74 : f32 to vector<8x256xf32>
    %232 = arith.select %230, %228, %231 : vector<8x256xi1>, vector<8x256xf32>
    %c2_i32_75 = arith.constant 2 : i32
    %233 = tpu.dynamic_rotate %129 by %c2_i32_75 dim 1 : vector<8x256xf32>, i32 -> vector<8x256xf32>
    %cst_76 = arith.constant 0.000000e+00 : f32
    %234 = vector.shape_cast %104 : vector<1x256xi1> to vector<1x256xi1>
    %235 = vector.broadcast %234 : vector<1x256xi1> to vector<8x256xi1>
    %236 = vector.broadcast %cst_76 : f32 to vector<8x256xf32>
    %237 = arith.select %235, %233, %236 : vector<8x256xi1>, vector<8x256xf32>
    %c1_i32_77 = arith.constant 1 : i32
    %238 = tpu.dynamic_rotate %129 by %c1_i32_77 dim 1 : vector<8x256xf32>, i32 -> vector<8x256xf32>
    %cst_78 = arith.constant 0.000000e+00 : f32
    %239 = vector.shape_cast %105 : vector<1x256xi1> to vector<1x256xi1>
    %240 = vector.broadcast %239 : vector<1x256xi1> to vector<8x256xi1>
    %241 = vector.broadcast %cst_78 : f32 to vector<8x256xf32>
    %242 = arith.select %240, %238, %241 : vector<8x256xi1>, vector<8x256xf32>
    %cst_79 = arith.constant 0.000000e+00 : f32
    %243 = vector.shape_cast %106 : vector<1x256xi1> to vector<1x256xi1>
    %244 = vector.broadcast %243 : vector<1x256xi1> to vector<8x256xi1>
    %245 = vector.broadcast %cst_79 : f32 to vector<8x256xf32>
    %246 = arith.select %244, %129, %245 : vector<8x256xi1>, vector<8x256xf32>
    %c255_i32_80 = arith.constant 255 : i32
    %247 = tpu.dynamic_rotate %129 by %c255_i32_80 dim 1 : vector<8x256xf32>, i32 -> vector<8x256xf32>
    %cst_81 = arith.constant 0.000000e+00 : f32
    %248 = vector.shape_cast %107 : vector<1x256xi1> to vector<1x256xi1>
    %249 = vector.broadcast %248 : vector<1x256xi1> to vector<8x256xi1>
    %250 = vector.broadcast %cst_81 : f32 to vector<8x256xf32>
    %251 = arith.select %249, %247, %250 : vector<8x256xi1>, vector<8x256xf32>
    %c254_i32 = arith.constant 254 : i32
    %252 = tpu.dynamic_rotate %129 by %c254_i32 dim 1 : vector<8x256xf32>, i32 -> vector<8x256xf32>
    %cst_82 = arith.constant 0.000000e+00 : f32
    %253 = vector.shape_cast %108 : vector<1x256xi1> to vector<1x256xi1>
    %254 = vector.broadcast %253 : vector<1x256xi1> to vector<8x256xi1>
    %255 = vector.broadcast %cst_82 : f32 to vector<8x256xf32>
    %256 = arith.select %254, %252, %255 : vector<8x256xi1>, vector<8x256xf32>
    %c242_i32 = arith.constant 242 : i32
    %257 = tpu.dynamic_rotate %129 by %c242_i32 dim 1 : vector<8x256xf32>, i32 -> vector<8x256xf32>
    %cst_83 = arith.constant 0.000000e+00 : f32
    %258 = vector.shape_cast %109 : vector<1x256xi1> to vector<1x256xi1>
    %259 = vector.broadcast %258 : vector<1x256xi1> to vector<8x256xi1>
    %260 = vector.broadcast %cst_83 : f32 to vector<8x256xf32>
    %261 = arith.select %259, %257, %260 : vector<8x256xi1>, vector<8x256xf32>
    %c241_i32_84 = arith.constant 241 : i32
    %262 = tpu.dynamic_rotate %129 by %c241_i32_84 dim 1 : vector<8x256xf32>, i32 -> vector<8x256xf32>
    %cst_85 = arith.constant 0.000000e+00 : f32
    %263 = vector.shape_cast %110 : vector<1x256xi1> to vector<1x256xi1>
    %264 = vector.broadcast %263 : vector<1x256xi1> to vector<8x256xi1>
    %265 = vector.broadcast %cst_85 : f32 to vector<8x256xf32>
    %266 = arith.select %264, %262, %265 : vector<8x256xi1>, vector<8x256xf32>
    %c240_i32_86 = arith.constant 240 : i32
    %267 = tpu.dynamic_rotate %129 by %c240_i32_86 dim 1 : vector<8x256xf32>, i32 -> vector<8x256xf32>
    %cst_87 = arith.constant 0.000000e+00 : f32
    %268 = vector.shape_cast %111 : vector<1x256xi1> to vector<1x256xi1>
    %269 = vector.broadcast %268 : vector<1x256xi1> to vector<8x256xi1>
    %270 = vector.broadcast %cst_87 : f32 to vector<8x256xf32>
    %271 = arith.select %269, %267, %270 : vector<8x256xi1>, vector<8x256xf32>
    %c239_i32_88 = arith.constant 239 : i32
    %272 = tpu.dynamic_rotate %129 by %c239_i32_88 dim 1 : vector<8x256xf32>, i32 -> vector<8x256xf32>
    %cst_89 = arith.constant 0.000000e+00 : f32
    %273 = vector.shape_cast %112 : vector<1x256xi1> to vector<1x256xi1>
    %274 = vector.broadcast %273 : vector<1x256xi1> to vector<8x256xi1>
    %275 = vector.broadcast %cst_89 : f32 to vector<8x256xf32>
    %276 = arith.select %274, %272, %275 : vector<8x256xi1>, vector<8x256xf32>
    %c238_i32 = arith.constant 238 : i32
    %277 = tpu.dynamic_rotate %129 by %c238_i32 dim 1 : vector<8x256xf32>, i32 -> vector<8x256xf32>
    %cst_90 = arith.constant 0.000000e+00 : f32
    %278 = vector.shape_cast %113 : vector<1x256xi1> to vector<1x256xi1>
    %279 = vector.broadcast %278 : vector<1x256xi1> to vector<8x256xi1>
    %280 = vector.broadcast %cst_90 : f32 to vector<8x256xf32>
    %281 = arith.select %279, %277, %280 : vector<8x256xi1>, vector<8x256xf32>
    %c226_i32 = arith.constant 226 : i32
    %282 = tpu.dynamic_rotate %129 by %c226_i32 dim 1 : vector<8x256xf32>, i32 -> vector<8x256xf32>
    %cst_91 = arith.constant 0.000000e+00 : f32
    %283 = vector.shape_cast %114 : vector<1x256xi1> to vector<1x256xi1>
    %284 = vector.broadcast %283 : vector<1x256xi1> to vector<8x256xi1>
    %285 = vector.broadcast %cst_91 : f32 to vector<8x256xf32>
    %286 = arith.select %284, %282, %285 : vector<8x256xi1>, vector<8x256xf32>
    %c225_i32 = arith.constant 225 : i32
    %287 = tpu.dynamic_rotate %129 by %c225_i32 dim 1 : vector<8x256xf32>, i32 -> vector<8x256xf32>
    %cst_92 = arith.constant 0.000000e+00 : f32
    %288 = vector.shape_cast %115 : vector<1x256xi1> to vector<1x256xi1>
    %289 = vector.broadcast %288 : vector<1x256xi1> to vector<8x256xi1>
    %290 = vector.broadcast %cst_92 : f32 to vector<8x256xf32>
    %291 = arith.select %289, %287, %290 : vector<8x256xi1>, vector<8x256xf32>
    %c224_i32 = arith.constant 224 : i32
    %292 = tpu.dynamic_rotate %129 by %c224_i32 dim 1 : vector<8x256xf32>, i32 -> vector<8x256xf32>
    %cst_93 = arith.constant 0.000000e+00 : f32
    %293 = vector.shape_cast %116 : vector<1x256xi1> to vector<1x256xi1>
    %294 = vector.broadcast %293 : vector<1x256xi1> to vector<8x256xi1>
    %295 = vector.broadcast %cst_93 : f32 to vector<8x256xf32>
    %296 = arith.select %294, %292, %295 : vector<8x256xi1>, vector<8x256xf32>
    %c223_i32 = arith.constant 223 : i32
    %297 = tpu.dynamic_rotate %129 by %c223_i32 dim 1 : vector<8x256xf32>, i32 -> vector<8x256xf32>
    %cst_94 = arith.constant 0.000000e+00 : f32
    %298 = vector.shape_cast %117 : vector<1x256xi1> to vector<1x256xi1>
    %299 = vector.broadcast %298 : vector<1x256xi1> to vector<8x256xi1>
    %300 = vector.broadcast %cst_94 : f32 to vector<8x256xf32>
    %301 = arith.select %299, %297, %300 : vector<8x256xi1>, vector<8x256xf32>
    %c222_i32 = arith.constant 222 : i32
    %302 = tpu.dynamic_rotate %129 by %c222_i32 dim 1 : vector<8x256xf32>, i32 -> vector<8x256xf32>
    %cst_95 = arith.constant 0.000000e+00 : f32
    %303 = vector.shape_cast %118 : vector<1x256xi1> to vector<1x256xi1>
    %304 = vector.broadcast %303 : vector<1x256xi1> to vector<8x256xi1>
    %305 = vector.broadcast %cst_95 : f32 to vector<8x256xf32>
    %306 = arith.select %304, %302, %305 : vector<8x256xi1>, vector<8x256xf32>
    %307 = tpu.concatenate %187, %192, %197, %202, %207, %212, %217, %222, %227, %232, %237, %242, %246, %251, %256, %261 in 0 : vector<8x256xf32>, vector<8x256xf32>, vector<8x256xf32>, vector<8x256xf32>, vector<8x256xf32>, vector<8x256xf32>, vector<8x256xf32>, vector<8x256xf32>, vector<8x256xf32>, vector<8x256xf32>, vector<8x256xf32>, vector<8x256xf32>, vector<8x256xf32>, vector<8x256xf32>, vector<8x256xf32>, vector<8x256xf32> -> vector<128x256xf32>
    %308 = tpu.concatenate %266, %271, %276, %281, %286, %291, %296, %301, %306 in 0 : vector<8x256xf32>, vector<8x256xf32>, vector<8x256xf32>, vector<8x256xf32>, vector<8x256xf32>, vector<8x256xf32>, vector<8x256xf32>, vector<8x256xf32>, vector<8x256xf32> -> vector<72x256xf32>
    %309 = tpu.concatenate %307, %308 in 0 : vector<128x256xf32>, vector<72x256xf32> -> vector<200x256xf32>
    %c0_96 = arith.constant 0 : index
    %c0_97 = arith.constant 0 : index
    %310 = vector.load %arg8[%c0_96, %c0_97] : memref<8x200xbf16, #tpu.memory_space<vmem>>, vector<8x200xbf16>
    %311 = arith.truncf %309 : vector<200x256xf32> to vector<200x256xbf16>
    %cst_98 = arith.constant dense<0.000000e+00> : vector<8x256xf32>
    %312 = tpu.matmul %310, %311, %cst_98 {dimension_numbers = #tpu.dot_dimension_numbers<[1], [0], [0], [1], [0, 0, 1, 1], [], []>} : vector<8x200xbf16>, vector<200x256xbf16>, vector<8x256xf32> -> vector<8x256xf32>
    %c0_99 = arith.constant 0 : index
    %c0_100 = arith.constant 0 : index
    %313 = vector.load %arg9[%c0_99, %c0_100] : memref<8x1xf32, #tpu.memory_space<vmem>>, vector<8x1xf32>
    %314 = vector.broadcast %313 : vector<8x1xf32> to vector<8x256xf32>
    %315 = arith.addf %312, %314 : vector<8x256xf32>
    %cst_101 = arith.constant 0.000000e+00 : f32
    %316 = vector.broadcast %cst_101 : f32 to vector<8x256xf32>
    %317 = arith.maximumf %315, %316 : vector<8x256xf32>
    %c17_i32_102 = arith.constant 17 : i32
    %318 = tpu.dynamic_rotate %1 by %c17_i32_102 dim 1 : vector<4x256xf32>, i32 -> vector<4x256xf32>
    %cst_103 = arith.constant 0xFF800000 : f32
    %319 = vector.shape_cast %100 : vector<1x256xi1> to vector<1x256xi1>
    %320 = vector.broadcast %319 : vector<1x256xi1> to vector<4x256xi1>
    %321 = vector.broadcast %cst_103 : f32 to vector<4x256xf32>
    %322 = arith.select %320, %318, %321 : vector<4x256xi1>, vector<4x256xf32>
    %c16_i32_104 = arith.constant 16 : i32
    %323 = tpu.dynamic_rotate %1 by %c16_i32_104 dim 1 : vector<4x256xf32>, i32 -> vector<4x256xf32>
    %cst_105 = arith.constant 0xFF800000 : f32
    %324 = vector.shape_cast %101 : vector<1x256xi1> to vector<1x256xi1>
    %325 = vector.broadcast %324 : vector<1x256xi1> to vector<4x256xi1>
    %326 = vector.broadcast %cst_105 : f32 to vector<4x256xf32>
    %327 = arith.select %325, %323, %326 : vector<4x256xi1>, vector<4x256xf32>
    %c15_i32_106 = arith.constant 15 : i32
    %328 = tpu.dynamic_rotate %1 by %c15_i32_106 dim 1 : vector<4x256xf32>, i32 -> vector<4x256xf32>
    %cst_107 = arith.constant 0xFF800000 : f32
    %329 = vector.shape_cast %102 : vector<1x256xi1> to vector<1x256xi1>
    %330 = vector.broadcast %329 : vector<1x256xi1> to vector<4x256xi1>
    %331 = vector.broadcast %cst_107 : f32 to vector<4x256xf32>
    %332 = arith.select %330, %328, %331 : vector<4x256xi1>, vector<4x256xf32>
    %c1_i32_108 = arith.constant 1 : i32
    %333 = tpu.dynamic_rotate %1 by %c1_i32_108 dim 1 : vector<4x256xf32>, i32 -> vector<4x256xf32>
    %cst_109 = arith.constant 0xFF800000 : f32
    %334 = vector.shape_cast %105 : vector<1x256xi1> to vector<1x256xi1>
    %335 = vector.broadcast %334 : vector<1x256xi1> to vector<4x256xi1>
    %336 = vector.broadcast %cst_109 : f32 to vector<4x256xf32>
    %337 = arith.select %335, %333, %336 : vector<4x256xi1>, vector<4x256xf32>
    %cst_110 = arith.constant 0xFF800000 : f32
    %338 = vector.shape_cast %106 : vector<1x256xi1> to vector<1x256xi1>
    %339 = vector.broadcast %338 : vector<1x256xi1> to vector<4x256xi1>
    %340 = vector.broadcast %cst_110 : f32 to vector<4x256xf32>
    %341 = arith.select %339, %1, %340 : vector<4x256xi1>, vector<4x256xf32>
    %c255_i32_111 = arith.constant 255 : i32
    %342 = tpu.dynamic_rotate %1 by %c255_i32_111 dim 1 : vector<4x256xf32>, i32 -> vector<4x256xf32>
    %cst_112 = arith.constant 0xFF800000 : f32
    %343 = vector.shape_cast %107 : vector<1x256xi1> to vector<1x256xi1>
    %344 = vector.broadcast %343 : vector<1x256xi1> to vector<4x256xi1>
    %345 = vector.broadcast %cst_112 : f32 to vector<4x256xf32>
    %346 = arith.select %344, %342, %345 : vector<4x256xi1>, vector<4x256xf32>
    %c241_i32_113 = arith.constant 241 : i32
    %347 = tpu.dynamic_rotate %1 by %c241_i32_113 dim 1 : vector<4x256xf32>, i32 -> vector<4x256xf32>
    %cst_114 = arith.constant 0xFF800000 : f32
    %348 = vector.shape_cast %110 : vector<1x256xi1> to vector<1x256xi1>
    %349 = vector.broadcast %348 : vector<1x256xi1> to vector<4x256xi1>
    %350 = vector.broadcast %cst_114 : f32 to vector<4x256xf32>
    %351 = arith.select %349, %347, %350 : vector<4x256xi1>, vector<4x256xf32>
    %c240_i32_115 = arith.constant 240 : i32
    %352 = tpu.dynamic_rotate %1 by %c240_i32_115 dim 1 : vector<4x256xf32>, i32 -> vector<4x256xf32>
    %cst_116 = arith.constant 0xFF800000 : f32
    %353 = vector.shape_cast %111 : vector<1x256xi1> to vector<1x256xi1>
    %354 = vector.broadcast %353 : vector<1x256xi1> to vector<4x256xi1>
    %355 = vector.broadcast %cst_116 : f32 to vector<4x256xf32>
    %356 = arith.select %354, %352, %355 : vector<4x256xi1>, vector<4x256xf32>
    %c239_i32_117 = arith.constant 239 : i32
    %357 = tpu.dynamic_rotate %1 by %c239_i32_117 dim 1 : vector<4x256xf32>, i32 -> vector<4x256xf32>
    %cst_118 = arith.constant 0xFF800000 : f32
    %358 = vector.shape_cast %112 : vector<1x256xi1> to vector<1x256xi1>
    %359 = vector.broadcast %358 : vector<1x256xi1> to vector<4x256xi1>
    %360 = vector.broadcast %cst_118 : f32 to vector<4x256xf32>
    %361 = arith.select %359, %357, %360 : vector<4x256xi1>, vector<4x256xf32>
    %362 = arith.maximumf %322, %327 : vector<4x256xf32>
    %363 = arith.maximumf %362, %332 : vector<4x256xf32>
    %364 = arith.maximumf %363, %337 : vector<4x256xf32>
    %365 = arith.maximumf %364, %341 : vector<4x256xf32>
    %366 = arith.maximumf %365, %346 : vector<4x256xf32>
    %367 = arith.maximumf %366, %351 : vector<4x256xf32>
    %368 = arith.maximumf %367, %356 : vector<4x256xf32>
    %369 = arith.maximumf %368, %361 : vector<4x256xf32>
    %c0_119 = arith.constant 0 : index
    %c0_120 = arith.constant 0 : index
    %370 = vector.load %arg10[%c0_119, %c0_120] : memref<8x4xbf16, #tpu.memory_space<vmem>>, vector<8x4xbf16>
    %371 = arith.truncf %369 : vector<4x256xf32> to vector<4x256xbf16>
    %cst_121 = arith.constant dense<0.000000e+00> : vector<8x256xf32>
    %372 = tpu.matmul %370, %371, %cst_121 {dimension_numbers = #tpu.dot_dimension_numbers<[1], [0], [0], [1], [0, 0, 1, 1], [], []>} : vector<8x4xbf16>, vector<4x256xbf16>, vector<8x256xf32> -> vector<8x256xf32>
    %c0_122 = arith.constant 0 : index
    %c0_123 = arith.constant 0 : index
    %373 = vector.load %arg11[%c0_122, %c0_123] : memref<8x1xf32, #tpu.memory_space<vmem>>, vector<8x1xf32>
    %374 = vector.broadcast %373 : vector<8x1xf32> to vector<8x256xf32>
    %375 = arith.addf %372, %374 : vector<8x256xf32>
    %cst_124 = arith.constant 0.000000e+00 : f32
    %376 = vector.broadcast %cst_124 : f32 to vector<8x256xf32>
    %377 = arith.maximumf %375, %376 : vector<8x256xf32>
    %c0_125 = arith.constant 0 : index
    %c0_126 = arith.constant 0 : index
    %c0_127 = arith.constant 0 : index
    %378 = vector.load %arg12[%c0_125, %c0_126, %c0_127] : memref<1x32x256xf32, #tpu.memory_space<vmem>>, vector<1x8x256xf32>
    %379 = vector.shape_cast %378 : vector<1x8x256xf32> to vector<8x256xf32>
    %380 = vector.shape_cast %127 : vector<8x256xf32> to vector<1x8x256xf32>
    tpu.vector_store %arg12[%c0_125, %c0_126, %c0_127], %380 {strides = array<i32>} : memref<1x32x256xf32, #tpu.memory_space<vmem>>, vector<1x8x256xf32>,
    %c0_128 = arith.constant 0 : index
    %c8 = arith.constant 8 : index
    %c0_129 = arith.constant 0 : index
    %381 = vector.load %arg12[%c0_128, %c8, %c0_129] : memref<1x32x256xf32, #tpu.memory_space<vmem>>, vector<1x8x256xf32>
    %382 = vector.shape_cast %381 : vector<1x8x256xf32> to vector<8x256xf32>
    %383 = vector.shape_cast %182 : vector<8x256xf32> to vector<1x8x256xf32>
    tpu.vector_store %arg12[%c0_128, %c8, %c0_129], %383 {strides = array<i32>} : memref<1x32x256xf32, #tpu.memory_space<vmem>>, vector<1x8x256xf32>,
    %c0_130 = arith.constant 0 : index
    %c16 = arith.constant 16 : index
    %c0_131 = arith.constant 0 : index
    %384 = vector.load %arg12[%c0_130, %c16, %c0_131] : memref<1x32x256xf32, #tpu.memory_space<vmem>>, vector<1x8x256xf32>
    %385 = vector.shape_cast %384 : vector<1x8x256xf32> to vector<8x256xf32>
    %386 = vector.shape_cast %317 : vector<8x256xf32> to vector<1x8x256xf32>
    tpu.vector_store %arg12[%c0_130, %c16, %c0_131], %386 {strides = array<i32>} : memref<1x32x256xf32, #tpu.memory_space<vmem>>, vector<1x8x256xf32>,
    %c0_132 = arith.constant 0 : index
    %c24 = arith.constant 24 : index
    %c0_133 = arith.constant 0 : index
    %387 = vector.load %arg12[%c0_132, %c24, %c0_133] : memref<1x32x256xf32, #tpu.memory_space<vmem>>, vector<1x8x256xf32>
    %388 = vector.shape_cast %387 : vector<1x8x256xf32> to vector<8x256xf32>
    %389 = vector.shape_cast %377 : vector<8x256xf32> to vector<1x8x256xf32>
    tpu.vector_store %arg12[%c0_132, %c24, %c0_133], %389 {strides = array<i32>} : memref<1x32x256xf32, #tpu.memory_space<vmem>>, vector<1x8x256xf32>,
    return
  }
  func.func @transform_0(%arg0: i32) -> (i32, i32) {
    %c0_i32 = arith.constant 0 : i32
    %c0_i32_0 = arith.constant 0 : i32
    %c0_i32_1 = arith.constant 0 : i32
    return %c0_i32, %c0_i32_0 : i32, i32
  }
  func.func @transform_1(%arg0: i32) -> (i32, i32) {
    %c0_i32 = arith.constant 0 : i32
    %c0_i32_0 = arith.constant 0 : i32
    %c0_i32_1 = arith.constant 0 : i32
    return %c0_i32, %c0_i32_0 : i32, i32
  }
  func.func @transform_2(%arg0: i32) -> (i32, i32, i32) {
    %c0_i32 = arith.constant 0 : i32
    %c0_i32_0 = arith.constant 0 : i32
    %c0_i32_1 = arith.constant 0 : i32
    return %arg0, %c0_i32, %c0_i32_0 : i32, i32, i32
  }
  func.func @transform_3(%arg0: i32) -> (i32, i32) {
    %c0_i32 = arith.constant 0 : i32
    %c0_i32_0 = arith.constant 0 : i32
    %c0_i32_1 = arith.constant 0 : i32
    return %c0_i32, %c0_i32_0 : i32, i32
  }
  func.func @transform_4(%arg0: i32) -> (i32, i32) {
    %c0_i32 = arith.constant 0 : i32
    %c0_i32_0 = arith.constant 0 : i32
    %c0_i32_1 = arith.constant 0 : i32
    return %c0_i32, %c0_i32_0 : i32, i32
  }
  func.func @transform_5(%arg0: i32) -> (i32, i32) {
    %c0_i32 = arith.constant 0 : i32
    %c0_i32_0 = arith.constant 0 : i32
    %c0_i32_1 = arith.constant 0 : i32
    return %c0_i32, %c0_i32_0 : i32, i32
  }
  func.func @transform_6(%arg0: i32) -> (i32, i32) {
    %c0_i32 = arith.constant 0 : i32
    %c0_i32_0 = arith.constant 0 : i32
    %c0_i32_1 = arith.constant 0 : i32
    return %c0_i32, %c0_i32_0 : i32, i32
  }
  func.func @transform_7(%arg0: i32) -> (i32, i32) {
    %c0_i32 = arith.constant 0 : i32
    %c0_i32_0 = arith.constant 0 : i32
    %c0_i32_1 = arith.constant 0 : i32
    return %c0_i32, %c0_i32_0 : i32, i32
  }
  func.func @transform_8(%arg0: i32) -> (i32, i32) {
    %c0_i32 = arith.constant 0 : i32
    %c0_i32_0 = arith.constant 0 : i32
    %c0_i32_1 = arith.constant 0 : i32
    return %c0_i32, %c0_i32_0 : i32, i32
  }
  func.func @transform_9(%arg0: i32) -> (i32, i32) {
    %c0_i32 = arith.constant 0 : i32
    %c0_i32_0 = arith.constant 0 : i32
    %c0_i32_1 = arith.constant 0 : i32
    return %c0_i32, %c0_i32_0 : i32, i32
  }
  func.func @transform_10(%arg0: i32) -> (i32, i32) {
    %c0_i32 = arith.constant 0 : i32
    %c0_i32_0 = arith.constant 0 : i32
    %c0_i32_1 = arith.constant 0 : i32
    return %c0_i32, %c0_i32_0 : i32, i32
  }
  func.func @transform_11(%arg0: i32) -> (i32, i32, i32) {
    %c0_i32 = arith.constant 0 : i32
    %c0_i32_0 = arith.constant 0 : i32
    %c0_i32_1 = arith.constant 0 : i32
    return %arg0, %c0_i32, %c0_i32_0 : i32, i32, i32
  }
}

</mosaic_0001>

<bundles_post_ra>
// kernel: inception_forward.1
= control target key start
LH: loop header
LB: loop body
LE: loop exit
PB: predicated region body
PF: predicated region fallthrough
CT: control target
= control target key end

     0   :  { %s1944_s17 = smov 0   ;;  %s3154_s0 = inlined_call_operand.vmem [shape: s32[1,256], index: 0, kind: input, shape index: {}]   ;;  %s3155_s1 = inlined_call_operand.vmem [shape: s32[1,256], index: 1, kind: input, shape index: {}]   ;;  %s3156_s2 = inlined_call_operand.vmem [shape: f32[2,4,256], index: 2, kind: input, shape index: {}]   ;;  %s3157_s3 = inlined_call_operand.vmem [shape: bf16[24,4], index: 3, kind: input, shape index: {}]   ;;  %s3158_s4 = inlined_call_operand.vmem [shape: f32[24,1], index: 4, kind: input, shape index: {}]   ;;  %s3159_s5 = inlined_call_operand.vmem [shape: bf16[8,72], index: 5, kind: input, shape index: {}]   ;;  %s3160_s6 = inlined_call_operand.vmem [shape: f32[8,1], index: 6, kind: input, shape index: {}]   ;;  %s3161_s7 = inlined_call_operand.vmem [shape: bf16[8,200], index: 7, kind: input, shape index: {}]   ;;  %s3162_s8 = inlined_call_operand.vmem [shape: f32[8,1], index: 8, kind: input, shape index: {}]   ;;  %s3163_s9 = inlined_call_operand.vmem [shape: bf16[8,4], index: 9, kind: input, shape index: {}]   ;;  %s3164_s10 = inlined_call_operand.vmem [shape: f32[8,1], index: 10, kind: input, shape index: {}]   ;;  %s3165_s11 = inlined_call_operand.vmem [shape: f32[2,32,256], index: 11, kind: output, shape index: {}]  }
   0x1 LB: > { %s1488_s18 = sadd.s32 4294967295, %s1857_s17   ;;  %p1492_p0 = scmp.ge.s32.totalorder %s1857_s17, 1  ;;  %s1857_s17 = sphi %s1944_s17, %s21_s17  }
   0x2   : > { %p337_p1 = scmp.lt.s32.totalorder %s1857_s17, 3 }
   0x4   : > { %p338_p2 = pnand %p1492_p0, %p337_p1 }
   0x6   : > { %341 = sbr.rel (%p338_p2) target bundleno = 683 (0x2ab), region = 64 }
   0xd   : > { %p377_p3 = scmp.lt.s32.totalorder %s1488_s18, 1  ;;  %v3230_v0 = vmov 0   ;;  %v464_v1 = vld [vmem:[%s3158_s4 + $0x10] sm:$0xff]  ;;  %v463_v2 = vld [vmem:[%s3158_s4 + $0x8] sm:$0xff]  ;;  %vm3167_vm0 = vcmask 1041408   ;;  %v1846_v9 = vld [vmem:[%s3157_s3] sm:$0xff]   ;;  %v563_v42 = vlaneseq }
   0xe   : > { %534 = vmatprep.mubr.bf16.mxu1 %v3230_v0  ;;  %1643 = vset.pattern.permute.xlu0 %v3230_v0  ;;  %s1860_s29 = smov 16   ;;  %vm3166_vm1 = vcmask 31744   ;;  %s1861_s30 = smov 17   ;;  %v1847_v10 = vld [vmem:[%s3157_s3 + $0x8] ss:$0 sps:$4 sm:$0xff]   ;;  %v462_v31 = vld [vmem:[%s3158_s4] sm:$0xff] }
   0xf   : > { %s3513_s18 = smov (!%p377_p3, %s1488_s18), 1  ;;  %477 = vperm.xlu0 %1643, %v464_v1   ;;  %1844 = vset.pattern.permute.xlu1 %v3230_v0  ;;  %s1862_s12 = smov 15   ;;  %v1218_v32 = vld [vmem:[%s3162_s8] sm:$0xff]  ;;  %vm3168_vm2 = vcmask 588800   ;;  %v3239_v43 = vmov 0  ;;  %v3241_v44 = vmov 0 }
  0x10   : > { %s1608_s23 = sshll.u32 %s3513_s18, 3  ;;  %s1863_s15 = smov 1   ;;  %v2058_v33 = vld [vmem:[%s3154_s0] sm:$0x3]  ;;  %v570_v45 = vshrl.u32 %v563_v42, 7  ;;  %v3243_v46 = vmov 0 }
  0x11   : > { %s381_s26 = scalar_lea.vmem %s3156_s2, %s1608_s23  ;;  %s1864_s16 = smov 127   ;;  %v2063_v34 = vld [vmem:[%s3155_s1] sm:$0x3]  ;;  %v395_v37 = vadd.s32 4294967295, %v2058_v33  ;;  %v3245_v48 = vmov 0  ;;  %v2104_v49 = vand.u32 127, %v563_v42 }
  0x12   : > { %v1967_v3 = vld [vmem:[%s381_s26] sm:$0xff]  ;;  %s1865_s19 = smov 113   ;;  %s1866_s20 = smov 112   ;;  %v414_v39 = vadd.s32 4294967295, %v2063_v34  ;;  %v421_v40 = vadd.s32 1, %v2063_v34  ;;  %vm418_vm7 = vcmp.ge.s32.totalorder %v2063_v34, 0 }
  0x13   : > { %472 = vperm.xlu0 %1643, %v463_v2   ;;  %v1971_v4 = vcombine.high %v1967_v3, %v1967_v3  ;;  %v460_v5 = vpack.c.bf16 %v1967_v3, %v1967_v3  ;;  %s1867_s21 = smov 111   ;;  %s1868_s22 = smov 34   ;;  %v1191_v35 = vld [vmem:[%s3161_s7] sm:$0xff]  ;;  %vm396_vm3 = vcmp.ge.s32.totalorder %v395_v37, 0  ;;  %vm397_vm4 = vcmp.lt.s32.totalorder %v395_v37, 16 }
  0x14   : > { %s1869_s23 = smov 32   ;;  %s1870_s24 = smov 33   ;;  %v1529_v36 = vcombine.high %v1191_v35, %v1191_v35  ;;  %v745_v38 = vld [vmem:[%s3160_s6] sm:$0xff]  ;;  %vm415_vm5 = vcmp.ge.s32.totalorder %v414_v39, 0  ;;  %vm416_vm6 = vcmp.lt.s32.totalorder %v414_v39, 16  ;;  %vm419_vm8 = vcmp.lt.s32.totalorder %v2063_v34, 16  ;;  %vm2080_vm9 = vmand %vm396_vm3, %vm397_vm4 }
  0x15   : > { %v461_v6 = vpack.c.bf16 %v1971_v4, %v1971_v4  ;;  %v497_v7 = vsel %vm3167_vm0, %v460_v5, 0  ;;  %v1980_v8 = vpack.i.bf16 %v1971_v4, %v1967_v3  ;;  %s1871_s25 = smov 30   ;;  %s1872_s26 = smov 31   ;;  %v1367_v41 = vld [vmem:[%s3164_s10] sm:$0xff]  ;;  %v3240_v43 = vsel %vm2080_vm9, 4294967295, %v3239_v43  ;;  %vm2084_vm12 = vmand %vm415_vm5, %vm416_vm6 }
  0x16   : > { %s1873_s27 = smov 18   ;;  %s1874_s28 = smov 2   ;;  %1603 = vmatprep.mubr.msk.bf16.mxu0 %vm3168_vm2, %v1529_v36  ;;  %vm422_vm10 = vcmp.ge.s32.totalorder %v421_v40, 0  ;;  %vm423_vm11 = vcmp.lt.s32.totalorder %v421_v40, 16  ;;  %v3242_v44 = vsel %vm2084_vm12, 4294967295, %v3241_v44  ;;  %vm2088_vm13 = vmand %vm418_vm7, %vm419_vm8  ;;  %v2106_v51 = vsub.s32 0, %v570_v45 }
  0x17   : > { %1499 = vmatprep.subr.msk.bf16.mxu1 %vm3167_vm0, %v461_v6  ;;  %1650 = vrot.lane.b32.xlu0 %v1980_v8, %s1860_s29  ;;  %s1875_s13 = smov 14   ;;  %s1876_s14 = smov 114   ;;  %v3244_v46 = vsel %vm2088_vm13, 4294967295, %v3243_v46  ;;  %vm2092_vm14 = vmand %vm422_vm10, %vm423_vm11  ;;  %v2108_v52 = vsub.s32 1, %v570_v45  ;;  %vm399_vm5 = vcmp.ge.s32.totalorder %v2058_v33, 0  ;;  %vm400_vm6 = vcmp.lt.s32.totalorder %v2058_v33, 16 }
  0x18   : > { %503 = vmatpush1.bf16.msra.mxu1 %v497_v7  ;;  %1645 = vrot.lane.b32.xlu1 %v1980_v8, %s1861_s30  ;;  %v3246_v48 = vsel %vm2092_vm14, 4294967295, %v3245_v48  ;;  %vm435_vm15 = vmand %vm2080_vm9, %vm2084_vm12  ;;  %vm3171_vm7 = vcmp.lt.s32.totalorder %v2104_v49, 16  ;;  %v3247_v61 = vmov 0  ;;  %vm3170_vm10 = vcmp.lt.s32.totalorder %v2104_v49, 17 }
  0x19   : > { %vm436_vm3 = vmand %vm2080_vm9, %vm2088_vm13  ;;  %v568_v53 = vsel %vm435_vm15, 1, %v3230_v0  ;;  %vm3169_vm11 = vcmp.lt.s32.totalorder %v2104_v49, 15 }
  0x1a   : > { %vm437_vm4 = vmand %vm2080_vm9, %vm2092_vm14  ;;  %v588_v54 = vsel %vm436_vm3, 1, %v3230_v0  ;;  %v572_v62 = vrot.slane %v568_v53, %v2106_v51  ;;  %v576_v63 = vrot.slane %v568_v53, %v2108_v52 }
  0x1b   : > { %1500 = vmatmul.mubr.msk.bf16.vlgmr.msra.gmra.mrb[0].mxu1 %vm3166_vm1, %v1846_v9  ;;  %1655 = vrot.lane.b32.xlu0 %v1980_v8, %s1862_s12  ;;  %v608_v60 = vsel %vm437_vm4, 1, %v3230_v0  ;;  %vm2120_vm8 = vmand %vm399_vm5, %vm400_vm6  ;;  %v592_v1 = vrot.slane %v588_v54, %v2106_v51  ;;  %v596_v2 = vrot.slane %v588_v54, %v2108_v52 }
  0x1c   : > { %544 = vmatprep.mubr.bf16.mxu1 %v3230_v0  ;;  %1660 = vrot.lane.b32.xlu1 %v1980_v8, %s1863_s15  ;;  %v3248_v61 = vsel %vm2120_vm8, 4294967295, %v3247_v61  ;;  %v612_v9 = vrot.slane %v608_v60, %v2106_v51  ;;  %vm440_vm15 = vmand %vm2120_vm8, %vm2084_vm12  ;;  %vm2143_vm3 = vcmp.eq.s32.totalorder %v576_v63, 1  ;;  %vm2147_vm4 = vcmp.eq.s32.totalorder %v572_v62, 1 }
  0x1d   : > { %vm2151_vm5 = vcmp.eq.s32.totalorder %v596_v2, 1  ;;  %vm2155_vm6 = vcmp.eq.s32.totalorder %v592_v1, 1  ;;  %vm441_vm0 = vmand %vm2120_vm8, %vm2088_vm13  ;;  %v3265_v63 = vmov 0 }
  0x1f   : > { %1670 = vrot.lane.b32.xlu0 %v1980_v8, %s1865_s19 }
  0x20   : > { %1665 = vrot.lane.b32.xlu1 %v1980_v8, %s1864_s16 }
  0x23   : > { %1501 = vmatmul.mubr.msk.bf16.gmra.mrb[4].mxu1 %vm3166_vm1, %v1847_v10  ;;  %vm2164_vm1 = vcmp.eq.s32.totalorder %v612_v9, 1 }
  0x24   : > { %794 = vmatprep.mubr.bf16.mxu1 %v3230_v0 }
  0x8a   : > { %v1646_v50 = vpop.permute.xlu1 %1645 }
  0x8b   : > { %v1648_v57 = vunpack.i.h.bf16 %v1646_v50  ;;  %v1647_v58 = vunpack.i.l.bf16 %v1646_v50 }
  0x8d   : > { %v1286_v10 = vsel %vm3170_vm10, %v1647_v58, %v1648_v57 }
  0x8e   : > { %v478_v11 = vpop.permute.xlu0 %477  ;;  %v1289_v37 = vsel %vm2143_vm3, %v1286_v10, -inf }
  0x92   : > { %v473_v14 = vpop.permute.xlu0 %472 }
  0x96   : > { %v1651_v47 = vpop.permute.xlu0 %1650 }
  0x97   : > { %v1653_v55 = vunpack.i.h.bf16 %v1651_v47  ;;  %v1652_v56 = vunpack.i.l.bf16 %v1651_v47  ;;  %v641_v47 = vsel %vm441_vm0, 1, %v3230_v0 }
  0x98   : > { %v645_v2 = vrot.slane %v641_v47, %v2106_v51 }
  0x99   : > { %v1294_v7 = vsel %vm3171_vm7, %v1652_v56, %v1653_v55 }
  0x9a   : > { %v1656_v59 = vpop.permute.xlu0 %1655 }
  0x9b   : > { %v1658_v5 = vunpack.i.h.bf16 %v1656_v59  ;;  %v1657_v6 = vunpack.i.l.bf16 %v1656_v59  ;;  %v3263_v59 = vmov 0 }
  0xee   : > { %v2005_v12 = vpop.f32.mrb[0].mxu1 }
  0xef   : > { %3237 = vst [vmem:[#allocation2_spill] sm:$0xff] %v2005_v12  ;;  %v2007_v13 = vpop.f32.mrb[1].mxu1  ;;  %v3391_v12 = vmov 0 }
  0xf0   : > { %3238 = vst [vmem:[#allocation3_spill] sm:$0xff] %v2007_v13  ;;  %v540_v15 = vpop.f32.mrb[2].mxu1 }
  0xf1   : > { %v2009_v16 = vadd.f32 %v540_v15, %v473_v14  ;;  %v542_v17 = vpop.f32.mrb[3].mxu1  ;;  %v3249_v15 = vmov 0 }
  0xf2   : > { %v2011_v18 = vadd.f32 %v542_v17, %v473_v14  ;;  %v1661_v14 = vpop.permute.xlu1 %1660  ;;  %v3250_v15 = vsel %vm2143_vm3, 4294967295, %v3249_v15  ;;  %v3251_v17 = vmov 0 }
  0xf3   : > { %v555_v19 = vmax.f32 %v2009_v16, 0.0  ;;  %v3252_v17 = vsel %vm2147_vm4, 4294967295, %v3251_v17  ;;  %v1663_v35 = vunpack.i.h.bf16 %v1661_v14  ;;  %v1662_v36 = vunpack.i.l.bf16 %v1661_v14  ;;  %v1671_v14 = vpop.permute.xlu0 %1670 }
  0xf4   : > { %v556_v20 = vmax.f32 %v2011_v18, 0.0 }
  0xf6   : > { %v546_v21 = vpop.f32.mrb[4].mxu1  ;;  %v1679_v22 = vpack.i.bf16 %v556_v20, %v555_v19  ;;  %v1666_v54 = vpop.permute.xlu1 %1665 }
  0xf7   : > { %v548_v23 = vpop.f32.mrb[5].mxu1  ;;  %v2023_v26 = vadd.f32 %v546_v21, %v478_v11  ;;  %v3253_v21 = vmov 0 }
  0xf8   : > { %1680 = vrot.lane.b32.xlu1 %v1679_v22, %s1860_s29  ;;  %1675 = vrot.lane.b32.xlu0 %v1679_v22, %s1861_s30  ;;  %v550_v24 = vpop.f32.mrb[6].mxu1  ;;  %v2025_v27 = vadd.f32 %v548_v23, %v478_v11  ;;  %v1287_v11 = vsel %vm3170_vm10, %v1648_v57, %v1647_v58  ;;  %v3254_v21 = vsel %vm2151_vm5, 4294967295, %v3253_v21  ;;  %v616_v23 = vrot.slane %v608_v60, %v2108_v52 }
  0xf9   : > { %v551_v25 = vpop.f32.mrb[7].mxu1  ;;  %v3224_v28 = vmax.f32 %v2023_v26, 0.0  ;;  %v402_v24 = vadd.s32 1, %v2058_v33  ;;  %v1288_v39 = vsel %vm2147_vm4, %v1287_v11, -inf  ;;  %vm3176_vm10 = vcmp.lt.s32.totalorder %v2104_v49, 1 }
  0xfa   : > { %v3225_v29 = vmax.f32 %v2025_v27, 0.0  ;;  %v1302_v25 = vsel %vm3169_vm11, %v1657_v6, %v1658_v5  ;;  %v3261_v57 = vmov 0  ;;  %v1310_v58 = vsel %vm3176_vm10, %v1662_v36, %v1663_v35 }
  0xfb   : > { %vm403_vm2 = vcmp.ge.s32.totalorder %v402_v24, 0  ;;  %v649_v60 = vrot.slane %v641_v47, %v2108_v52  ;;  %v1311_v1 = vsel %vm3176_vm10, %v1663_v35, %v1662_v36  ;;  %vm3187_vm10 = vcmp.lt.s32.totalorder %v2104_v49, 113 }
  0xfc   : > { %1685 = vrot.lane.b32.xlu1 %v1679_v22, %s1862_s12  ;;  %1690 = vrot.lane.b32.xlu0 %v1679_v22, %s1863_s15  ;;  %v1714_v30 = vpack.i.bf16 %v3225_v29, %v3224_v28  ;;  %v3275_v47 = vmov 0 }
 0x100   : > { %1695 = vrot.lane.b32.xlu1 %v1679_v22, %s1864_s16  ;;  %1700 = vrot.lane.b32.xlu0 %v1679_v22, %s1865_s19 }
 0x104   : > { %1705 = vrot.lane.b32.xlu1 %v1679_v22, %s1866_s20  ;;  %1710 = vrot.lane.b32.xlu0 %v1679_v22, %s1867_s21  ;;  %v3255_v22 = vmov 0 }
 0x105   : > { %v3256_v22 = vsel %vm2155_vm6, 4294967295, %v3255_v22 }
 0x108   : > { %1715 = vrot.lane.b32.xlu1 %v1714_v30, %s1868_s22  ;;  %1725 = vrot.lane.b32.xlu0 %v1714_v30, %s1869_s23 }
 0x10c   : > { %1720 = vrot.lane.b32.xlu1 %v1714_v30, %s1870_s24  ;;  %1735 = vrot.lane.b32.xlu0 %v1714_v30, %s1871_s25  ;;  %s1609_s25 = sshll.u32 %s3513_s18, 6 }
 0x110   : > { %1730 = vrot.lane.b32.xlu1 %v1714_v30, %s1872_s26  ;;  %1745 = vrot.lane.b32.xlu0 %v1714_v30, %s1861_s30  ;;  %s1877_s30 = smov 126  }
 0x114   : > { %1740 = vrot.lane.b32.xlu1 %v1714_v30, %s1873_s27  ;;  %1755 = vrot.lane.b32.xlu0 %v1714_v30, %s1862_s12  ;;  %s1879_s12 = smov 110  }
 0x118   : > { %1750 = vrot.lane.b32.xlu1 %v1714_v30, %s1860_s29  ;;  %1765 = vrot.lane.b32.xlu0 %v1714_v30, %s1874_s28  ;;  %s1878_s29 = smov 98   ;;  %s3141_s28 = scalar_lea.vmem %s3165_s11, %s1609_s25 }
 0x11c   : > { %1760 = vrot.lane.b32.xlu1 %v1714_v30, %s1875_s13  ;;  %1780 = vrot.lane.b32.xlu0 %v1714_v30, %s1864_s16  ;;  %s1880_s16 = smov 96  }
 0x120   : > { %1770 = vrot.lane.b32.xlu1 %v1714_v30, %s1863_s15  ;;  %1790 = vrot.lane.b32.xlu0 %v1714_v30, %s1876_s14  ;;  %s1881_s15 = smov 97   ;;  %s1883_s14 = smov 94  }
 0x124   : > { %1775 = vrot.lane.b32.xlu1 %v1980_v8, %s1866_s20  ;;  %1795 = vrot.lane.b32.xlu0 %v1714_v30, %s1865_s19  ;;  %s1882_s19 = smov 95  }
 0x128   : > { %1785 = vrot.lane.b32.xlu1 %v1714_v30, %s1877_s30  ;;  %1805 = vrot.lane.b32.xlu0 %v1714_v30, %s1867_s21 }
 0x12c   : > { %1800 = vrot.lane.b32.xlu1 %v1714_v30, %s1866_s20  ;;  %1815 = vrot.lane.b32.xlu0 %v1714_v30, %s1878_s29 }
 0x130   : > { %1810 = vrot.lane.b32.xlu1 %v1714_v30, %s1879_s12  ;;  %1825 = vrot.lane.b32.xlu0 %v1714_v30, %s1880_s16 }
 0x134   : > { %1820 = vrot.lane.b32.xlu1 %v1714_v30, %s1881_s15  ;;  %1830 = vrot.lane.b32.xlu0 %v1980_v8, %s1867_s21  ;;  %v1295_v8 = vsel %vm3171_vm7, %v1653_v55, %v1652_v56  ;;  %vm442_vm7 = vmand %vm2120_vm8, %vm2092_vm14  ;;  %vm3271_vm8 = vcmp.lt.s32.totalorder %v2104_v49, 127 }
 0x135   : > { %v1296_v40 = vsel %vm2155_vm6, %v1295_v8, -inf  ;;  %v661_v62 = vsel %vm442_vm7, 1, %v3230_v0  ;;  %vm2227_vm7 = vcmp.eq.s32.totalorder %v649_v60, 1 }
 0x136   : > { %v1348_v55 = vmax.f32 %v1288_v39, %v1296_v40  ;;  %v669_v10 = vrot.slane %v661_v62, %v2108_v52  ;;  %v3273_v39 = vmov 0  ;;  %v1315_v40 = vsel %vm2227_vm7, %v1971_v4, -inf }
 0x138   : > { %1835 = vrot.lane.b32.xlu1 %v1714_v30, %s1882_s19  ;;  %467 = vperm.xlu0 %1643, %v462_v31   ;;  %v3257_v31 = vmov 0 }
 0x139   : > { %v3258_v31 = vsel %vm2164_vm1, 4294967295, %v3257_v31 }
 0x13c   : > { %1840 = vrot.lane.b32.xlu1 %v1714_v30, %s1883_s14  ;;  %1221 = vperm.xlu0 %1643, %v1218_v32   ;;  %v628_v30 = vsel %vm440_vm15, 1, %v3230_v0  ;;  %v1303_v32 = vsel %vm3169_vm11, %v1658_v5, %v1657_v6  ;;  %vm2182_vm15 = vcmp.eq.s32.totalorder %v616_v23, 1  ;;  %vm404_vm11 = vcmp.lt.s32.totalorder %v402_v24, 16 }
 0x13d   : > { %v636_v42 = vrot.slane %v628_v30, %v2108_v52  ;;  %v632_v45 = vrot.slane %v628_v30, %v2106_v51  ;;  %v1304_v53 = vsel %vm2164_vm1, %v1303_v32, -inf  ;;  %v1305_v56 = vsel %vm2182_vm15, %v1302_v25, -inf  ;;  %vm2198_vm9 = vmand %vm403_vm2, %vm404_vm11 }
 0x13e   : > { %v3262_v57 = vsel %vm2198_vm9, 4294967295, %v3261_v57  ;;  %v1668_v5 = vunpack.i.h.bf16 %v1666_v54  ;;  %v1667_v6 = vunpack.i.l.bf16 %v1666_v54  ;;  %vm445_vm2 = vmand %vm2198_vm9, %vm2084_vm12  ;;  %v1350_v8 = vmax.f32 %v1348_v55, %v1304_v53 }
 0x13f   : > { %vm2204_vm6 = vcmp.eq.s32.totalorder %v636_v42, 1  ;;  %vm2210_vm0 = vcmp.eq.s32.totalorder %v632_v45, 1  ;;  %v3267_v23 = vmov 0  ;;  %v665_v24 = vrot.slane %v661_v62, %v2106_v51 }
 0x140   : > { %748 = vperm.xlu1 %1844, %v745_v38   ;;  %v1297_v38 = vsel %vm2151_vm5, %v1294_v7, -inf  ;;  %v3264_v59 = vsel %vm2204_vm6, 4294967295, %v3263_v59  ;;  %v3266_v63 = vsel %vm2210_vm0, 4294967295, %v3265_v63  ;;  %v1313_v9 = vsel %vm2204_vm6, %v1310_v58, -inf }
 0x141   : > { %v1349_v50 = vmax.f32 %v1289_v37, %v1297_v38  ;;  %v1312_v11 = vsel %vm2210_vm0, %v1311_v1, -inf  ;;  %v3268_v23 = vsel %vm2227_vm7, 4294967295, %v3267_v23  ;;  %v1673_v25 = vunpack.i.h.bf16 %v1671_v14  ;;  %vm3272_vm0 = vmmov %vm3271_vm8 }
 0x142   : > { %vm2233_vm11 = vcmp.eq.s32.totalorder %v645_v2, 1  ;;  %v3269_v30 = vmov 0  ;;  %v681_v32 = vsel %vm445_vm2, 1, %v3230_v0  ;;  %v1320_v35 = vsel %vm3271_vm8, %v1667_v6, %v1668_v5  ;;  %vm447_vm8 = vmand %vm2198_vm9, %vm2092_vm14 }
 0x143   : > { %v1351_v7 = vmax.f32 %v1349_v50, %v1305_v56  ;;  %v3270_v30 = vsel %vm2233_vm11, 4294967295, %v3269_v30  ;;  %v1321_v36 = vsel %vm3272_vm0, %v1668_v5, %v1667_v6  ;;  %v1672_v37 = vunpack.i.l.bf16 %v1671_v14  ;;  %vm446_vm0 = vmand %vm2198_vm9, %vm2088_vm13 }
 0x144   : > { %1370 = vperm.xlu1 %1844, %v1367_v41   ;;  %v3259_v41 = vmov 0  ;;  %vm2242_vm1 = vcmp.eq.s32.totalorder %v669_v10, 1  ;;  %v1352_v42 = vmax.f32 %v1350_v8, %v1312_v11  ;;  %v391_v45 = vadd.s32 4294967294, %v2058_v33 }
 0x145   : > { %v3260_v41 = vsel %vm2182_vm15, 4294967295, %v3259_v41  ;;  %v1353_v38 = vmax.f32 %v1351_v7, %v1313_v9  ;;  %v3274_v39 = vsel %vm2242_vm1, 4294967295, %v3273_v39  ;;  %vm2250_vm2 = vcmp.eq.s32.totalorder %v665_v24, 1 }
 0x146   : > { %v3276_v47 = vsel %vm2250_vm2, 4294967295, %v3275_v47  ;;  %v1314_v50 = vsel %vm2233_vm11, %v1967_v3, -inf  ;;  %v689_v53 = vrot.slane %v681_v32, %v2108_v52  ;;  %v410_v54 = vadd.s32 4294967294, %v2063_v34 }
 0x147   : > { %v1329_v4 = vsel %vm3187_vm10, %v1673_v25, %v1672_v37  ;;  %v1323_v55 = vsel %vm2242_vm1, %v1321_v36, -inf  ;;  %v1355_v56 = vmax.f32 %v1353_v38, %v1315_v40  ;;  %v685_v58 = vrot.slane %v681_v32, %v2106_v51 }
 0x148   : > { %v1322_v3 = vsel %vm2250_vm2, %v1320_v35, -inf  ;;  %v1354_v60 = vmax.f32 %v1352_v42, %v1314_v50  ;;  %vm392_vm11 = vcmp.ge.s32.totalorder %v391_v45, 0  ;;  %vm393_vm7 = vcmp.lt.s32.totalorder %v391_v45, 16 }
 0x149   : > { %v721_v62 = vsel %vm447_vm8, 1, %v3230_v0  ;;  %vm2275_vm10 = vcmp.eq.s32.totalorder %v689_v53, 1  ;;  %v3277_v1 = vmov 0  ;;  %vm411_vm1 = vcmp.ge.s32.totalorder %v410_v54, 0  ;;  %vm2288_vm9 = vmand %vm392_vm11, %vm393_vm7 }
 0x14a   : > { %v3278_v1 = vsel %vm2275_vm10, 4294967295, %v3277_v1  ;;  %vm412_vm14 = vcmp.lt.s32.totalorder %v410_v54, 16  ;;  %vm3279_vm12 = vcmp.lt.s32.totalorder %v2104_v49, 113  ;;  %v701_v5 = vsel %vm446_vm0, 1, %v3230_v0 }
 0x14b   : > { %v2281_v2 = vsel %vm3279_vm12, %v1672_v37, %v1673_v25  ;;  %vm2284_vm2 = vcmp.eq.s32.totalorder %v685_v58, 1  ;;  %v3280_v6 = vmov 0  ;;  %v729_v10 = vrot.slane %v721_v62, %v2108_v52  ;;  %vm2297_vm12 = vmand %vm411_vm1, %vm412_vm14 }
 0x14c   : > { %v3281_v6 = vsel %vm2284_vm2, 4294967295, %v3280_v6  ;;  %v1357_v11 = vmax.f32 %v1355_v56, %v1323_v55  ;;  %v2293_v14 = vmax.f32 %v1354_v60, %v1322_v3  ;;  %v1331_v24 = vsel %vm2275_vm10, %v1329_v4, -inf }
 0x14d   : > { %v3284_v25 = vmov 0  ;;  %vm3286_vm7 = vnez %v3256_v22  ;;  %v705_v38 = vrot.slane %v701_v5, %v2106_v51  ;;  %v709_v40 = vrot.slane %v701_v5, %v2108_v52 }
 0x14e   : > { %v3285_v25 = vsel %vm2297_vm12, 4294967295, %v3284_v25  ;;  %v725_v45 = vrot.slane %v721_v62, %v2106_v51  ;;  %vm3287_vm1 = vcmp.lt.s32.totalorder %v2104_v49, 16  ;;  %vm3289_vm0 = vcmp.lt.s32.totalorder %v2104_v49, 17 }
 0x14f   : > { %vm3288_vm14 = vmmov %vm3287_vm1  ;;  %v2333_v60 = vmax.f32 %v1357_v11, %v1331_v24  ;;  %v425_v62 = vadd.s32 2, %v2063_v34  ;;  %vm3293_vm11 = vnez %v3242_v44  ;;  %v3295_v34 = vmov 0 }
 0x150   : > { %vm3290_vm8 = vmmov %vm3289_vm0  ;;  %vm2353_vm10 = vcmp.eq.s32.totalorder %v705_v38, 1  ;;  %v3299_v11 = vmov 0 }
 0x16a   : > { %v1681_v8 = vpop.permute.xlu1 %1680  ;;  %v1676_v9 = vpop.permute.xlu0 %1675 }
 0x16b   : > { %v1683_v32 = vunpack.i.h.bf16 %v1681_v8  ;;  %v1682_v35 = vunpack.i.l.bf16 %v1681_v8  ;;  %v1678_v36 = vunpack.i.h.bf16 %v1676_v9  ;;  %v1677_v37 = vunpack.i.l.bf16 %v1676_v9 }
 0x16d   : > { %v586_v50 = vsel %vm3287_vm1, %v1682_v35, %v1683_v32  ;;  %v587_v53 = vsel %vm3288_vm14, %v1683_v32, %v1682_v35  ;;  %v566_v54 = vsel %vm3289_vm0, %v1677_v37, %v1678_v36  ;;  %v567_v4 = vsel %vm3290_vm8, %v1678_v36, %v1677_v37  ;;  %vm3294_vm0 = vmpackc.low %vm2151_vm5, %vm2143_vm3 }
 0x16e   : > { %v1503_v55 = vpack.c.bf16 %v586_v50, %v566_v54  ;;  %v1506_v56 = vpack.c.bf16 %v587_v53, %v567_v4  ;;  %v1686_v58 = vpop.permute.xlu1 %1685  ;;  %v1691_v3 = vpop.permute.xlu0 %1690  ;;  %vm2336_vm8 = vcmp.eq.s32.totalorder %v729_v10, 1  ;;  %v3291_v35 = vmov 0  ;;  %vm3302_vm1 = vmand %vm2288_vm9, %vm2297_vm12 }
 0x16f   : > { %v1688_v5 = vunpack.i.h.bf16 %v1686_v58  ;;  %v1687_v8 = vunpack.i.l.bf16 %v1686_v58  ;;  %v1693_v9 = vunpack.i.h.bf16 %v1691_v3  ;;  %v1692_v32 = vunpack.i.l.bf16 %v1691_v3 }
 0x170   : > { %v3292_v35 = vsel %vm2336_vm8, 4294967295, %v3291_v35  ;;  %1504 = vmatprep.subr.msk.bf16.mxu1 %vm3294_vm0, %v1503_v55  ;;  %vm2349_vm14 = vcmp.eq.s32.totalorder %v709_v40, 1  ;;  %v3297_v10 = vmov 0  ;;  %vm2357_vm8 = vcmp.eq.s32.totalorder %v725_v45, 1 }
 0x171   : > { %v3296_v34 = vsel %vm2349_vm14, 4294967295, %v3295_v34  ;;  %v3298_v10 = vsel %vm2353_vm10, 4294967295, %v3297_v10  ;;  %v3300_v11 = vsel %vm2357_vm8, 4294967295, %v3299_v11  ;;  %v2367_v24 = vsel %vm3302_vm1, 1, %v3230_v0  ;;  %vm3307_vm1 = vmpackc.low %vm3286_vm7, %vm2147_vm4 }
 0x172   : > { %3301 = vst [vmem:[#allocation4_spill] sm:$0xff] %v3300_v11  ;;  %vm3303_vm3 = vcmp.lt.s32.totalorder %v2104_v49, 15  ;;  %vm3305_vm8 = vcmp.lt.s32.totalorder %v2104_v49, 1  ;;  %1507 = vmatpush1.bf16.msk.msra.mxu1 %vm3307_vm1, %v1506_v56  ;;  %vm3308_vm0 = vnez %v3258_v31  ;;  %vm3309_vm12 = vnez %v3266_v63  ;;  %v1696_v53 = vpop.permute.xlu1 %1695  ;;  %v1701_v54 = vpop.permute.xlu0 %1700  ;;  %vm3312_vm4 = vmand %vm2288_vm9, %vm2088_vm13 }
 0x173   : > { %v606_v36 = vsel %vm3303_vm3, %v1687_v8, %v1688_v5  ;;  %vm3304_vm5 = vmmov %vm3303_vm3  ;;  %v626_v38 = vsel %vm3305_vm8, %v1692_v32, %v1693_v9  ;;  %v1698_v55 = vunpack.i.h.bf16 %v1696_v53  ;;  %v1697_v56 = vunpack.i.l.bf16 %v1696_v53 }
 0x174   : > { %v607_v37 = vsel %vm3304_vm5, %v1688_v5, %v1687_v8  ;;  %vm3306_vm14 = vmmov %vm3305_vm8  ;;  %v1509_v45 = vpack.c.bf16 %v626_v38, %v606_v36  ;;  %v2408_v58 = vsel %vm3312_vm4, 1, %v3230_v0  ;;  %v1703_v3 = vunpack.i.h.bf16 %v1701_v54 }
 0x175   : > { %v627_v40 = vsel %vm3306_vm14, %v1693_v9, %v1692_v32  ;;  %vm3310_vm5 = vmand %vm2288_vm9, %vm3293_vm11  ;;  %vm3311_vm14 = vnez %v3246_v48  ;;  %v1702_v5 = vunpack.i.l.bf16 %v1701_v54  ;;  %vm3314_vm1 = vnez %v3268_v23 }
 0x176   : > { %v1512_v50 = vpack.c.bf16 %v627_v40, %v607_v37  ;;  %v2396_v4 = vsel %vm3310_vm5, 1, %v3230_v0  ;;  %vm3313_vm5 = vmpackc.low %vm2204_vm6, %vm2182_vm15  ;;  %vm3315_vm3 = vnez %v3274_v39  ;;  %v820_v8 = vrot.slane %v2367_v24, %v2108_v52 }
 0x177   : > { %1510 = vmatprep.subr.msk.bf16.mxu1 %vm3313_vm5, %v1509_v45  ;;  %v816_v9 = vrot.slane %v2367_v24, %v2106_v51  ;;  %vm3316_vm4 = vcmp.lt.s32.totalorder %v2104_v49, 127  ;;  %vm3318_vm5 = vmpackc.low %vm3309_vm12, %vm3308_vm0  ;;  %vm3319_vm8 = vnez %v3270_v30  ;;  %vm3320_vm13 = vnez %v3276_v47  ;;  %v1706_v45 = vpop.permute.xlu1 %1705 }
 0x178   : > { %v659_v32 = vsel %vm3316_vm4, %v1697_v56, %v1698_v55  ;;  %vm3317_vm11 = vmmov %vm3316_vm4  ;;  %1513 = vmatpush1.bf16.msk.msra.mxu1 %vm3318_vm5, %v1512_v50  ;;  %v840_v24 = vrot.slane %v2396_v4, %v2108_v52  ;;  %v1711_v50 = vpop.permute.xlu0 %1710  ;;  %v836_v53 = vrot.slane %v2396_v4, %v2106_v51  ;;  %v860_v54 = vrot.slane %v2408_v58, %v2108_v52 }
 0x179   : > { %v660_v36 = vsel %vm3317_vm11, %v1698_v55, %v1697_v56  ;;  %vm3321_vm11 = vmand %vm2288_vm9, %vm3311_vm14  ;;  %v1518_v40 = vpack.c.bf16 %v659_v32, %v555_v19  ;;  %vm3322_vm4 = vcmp.lt.s32.totalorder %v425_v62, 16  ;;  %vm3323_vm5 = vcmp.ge.s32.totalorder %v425_v62, 0 }
 0x17a   : > { %v2444_v37 = vsel %vm3321_vm11, 1, %v3230_v0  ;;  %v1515_v38 = vpack.c.bf16 %v660_v36, %v556_v20  ;;  %vm2456_vm6 = vmand %vm3323_vm5, %vm3322_vm4  ;;  %v1708_v56 = vunpack.i.h.bf16 %v1706_v45  ;;  %v1707_v18 = vunpack.i.l.bf16 %v1706_v45 }
 0x17b   : > { %v1713_v20 = vunpack.i.h.bf16 %v1711_v50  ;;  %v1712_v36 = vunpack.i.l.bf16 %v1711_v50  ;;  %vm3326_vm14 = vcmp.lt.s32.totalorder %v2104_v49, 113  ;;  %vm3328_vm4 = vmpackc.low %vm3315_vm3, %vm3314_vm1  ;;  %vm3329_vm5 = vnez %v3278_v1 }
 0x17c   : > { %v679_v16 = vsel %vm3326_vm14, %v1702_v5, %v1703_v3  ;;  %vm3327_vm12 = vmmov %vm3326_vm14  ;;  %1516 = vmatprep.subr.msk.bf16.mxu1 %vm3328_vm4, %v1515_v38  ;;  %vm3330_vm0 = vnez %v3296_v34  ;;  %v880_v62 = vrot.slane %v2444_v37, %v2108_v52  ;;  %v856_v4 = vrot.slane %v2408_v58, %v2106_v51 }
 0x17d   : > { %v680_v19 = vsel %vm3327_vm12, %v1703_v3, %v1702_v5  ;;  %vm3331_vm14 = vcmp.lt.s32.totalorder %v2104_v49, 112  ;;  %vm3333_vm11 = vcmp.lt.s32.totalorder %v2104_v49, 111  ;;  %vm3335_vm7 = vmpackc.low %vm3320_vm13, %vm3319_vm8  ;;  %vm3338_vm8 = vnez %v3285_v25 }
 0x17e   : > { %v699_v3 = vsel %vm3331_vm14, %v1707_v18, %v1708_v56  ;;  %vm3332_vm12 = vmmov %vm3331_vm14  ;;  %v719_v32 = vsel %vm3333_vm11, %v1712_v36, %v1713_v20  ;;  %1519 = vmatpush1.bf16.msk.msra.mxu1 %vm3335_vm7, %v1518_v40  ;;  %vm3339_vm13 = vnez %v3240_v43  ;;  %vm2511_vm3 = vcmp.eq.s32.totalorder %v820_v8, 1 }
 0x17f   : > { %v700_v5 = vsel %vm3332_vm12, %v1708_v56, %v1707_v18  ;;  %vm3334_vm4 = vmmov %vm3333_vm11  ;;  %v1524_v45 = vpack.c.bf16 %v699_v3, %v679_v16  ;;  %vm3336_vm12 = vnez %v3292_v35  ;;  %v1716_v56 = vpop.permute.xlu1 %1715  ;;  %v2501_v18 = vpop.permute.xlu0 %1725  ;;  %vm3360_vm1 = vcmp.lt.s32.totalorder %v2104_v49, 33 }
 0x180   : > { %v720_v38 = vsel %vm3334_vm4, %v1713_v20, %v1712_v36  ;;  %v1521_v58 = vpack.c.bf16 %v700_v5, %v680_v19  ;;  %vm3337_vm4 = vnez %v3300_v11  ;;  %vm434_vm14 = vmand %vm3339_vm13, %vm3338_vm8  ;;  %v1717_v5 = vunpack.i.l.bf16 %v1716_v56 }
 0x181   : > { %v733_v50 = vsel %vm3336_vm12, %v720_v38, 0.0  ;;  %v732_v20 = vsel %vm3337_vm4, %v719_v32, 0.0  ;;  %vm2516_vm12 = vcmp.eq.s32.totalorder %v816_v9, 1  ;;  %vm3344_vm7 = vmpackc.low %vm3330_vm0, %vm3329_vm5  ;;  %vm2525_vm4 = vcmp.eq.s32.totalorder %v840_v24, 1 }
 0x182   : > { %1522 = vmatprep.subr.msk.bf16.mxu1 %vm3344_vm7, %v1521_v58  ;;  %v744_v16 = vpack.c.bf16 %v733_v50, %v733_v50  ;;  %v743_v19 = vpack.c.bf16 %v732_v20, %v732_v20  ;;  %vm3347_vm11 = vmand %vm2288_vm9, %vm2456_vm6  ;;  %v1718_v9 = vunpack.i.h.bf16 %v1716_v56  ;;  %vm2541_vm5 = vcmp.eq.s32.totalorder %v836_v53, 1 }
 0x183   : > { %v892_v8 = vsel %vm3347_vm11, 1, %v3230_v0  ;;  %vm3348_vm7 = vmpackc.low %vm2353_vm10, %vm2284_vm2  ;;  %v912_v7 = vsel %vm434_vm14, 1, %v3230_v0  ;;  %v1721_v32 = vpop.permute.xlu1 %1720  ;;  %v1736_v38 = vpop.permute.xlu0 %1735  ;;  %vm3351_vm9 = vcmask 1043456   ;;  %vm2548_vm0 = vcmp.eq.s32.totalorder %v860_v54, 1 }
 0x184   : > { %1525 = vmatpush1.bf16.msk.msra.mxu1 %vm3348_vm7, %v1524_v45  ;;  %vm2552_vm10 = vcmp.eq.s32.totalorder %v880_v62, 1  ;;  %vm2556_vm7 = vcmp.eq.s32.totalorder %v856_v4, 1  ;;  %v876_v50 = vrot.slane %v2444_v37, %v2106_v51  ;;  %v1723_v56 = vunpack.i.h.bf16 %v1721_v32  ;;  %vm3358_vm14 = vmmov %vm3351_vm9 }
 0x185   : > { %1526 = vmatprep.subr.msk.bf16.mxu1 %vm3351_vm9, %v744_v16  ;;  %v1722_v20 = vunpack.i.l.bf16 %v1721_v32  ;;  %v900_v16 = vrot.slane %v892_v8, %v2108_v52  ;;  %v896_v54 = vrot.slane %v892_v8, %v2106_v51  ;;  %v1728_v28 = vunpack.i.h.bf16 %v2501_v18  ;;  %vm438_vm9 = vmand %vm3339_vm13, %vm2456_vm6 }
 0x186   : > { %v1727_v62 = vunpack.i.l.bf16 %v2501_v18  ;;  %v757_v29 = vsel %vm3358_vm14, %v743_v19, 0  ;;  %v920_v4 = vrot.slane %v912_v7, %v2108_v52  ;;  %vm3359_vm11 = vcmp.lt.s32.totalorder %v2104_v49, 34  ;;  %vm1530_vm15 = vmpackc.low %vm2525_vm4, %vm2511_vm3 }
 0x187   : > { %v810_v37 = vsel %vm3359_vm11, %v1717_v5, %v1718_v9  ;;  %v830_v8 = vsel %vm3360_vm1, %v1722_v20, %v1723_v56  ;;  %vm3361_vm14 = vmmov %vm3359_vm11  ;;  %v1731_v32 = vpop.permute.xlu1 %1730  ;;  %v2587_v42 = vpop.permute.xlu0 %1745  ;;  %vm2593_vm11 = vcmp.eq.s32.totalorder %v876_v50, 1  ;;  %v3367_v11 = vmov 0  }
 0x188   : > { %771 = vmatpush1.bf16.msra.mxu1 %v757_v29  ;;  %v811_v18 = vsel %vm3361_vm14, %v1718_v9, %v1717_v5  ;;  %vm3362_vm2 = vmmov %vm3360_vm1  ;;  %v734_v29 = vld [vmem:[%s3159_s5] sm:$0xf]  ;;  %v1531_v0 = vpack.c.bf16 %v830_v8, %v810_v37  ;;  %v916_v9 = vrot.slane %v912_v7, %v2106_v51  ;;  %v1733_v5 = vunpack.i.h.bf16 %v1731_v32 }
 0x189   : > { %v831_v19 = vsel %vm3362_vm2, %v1723_v56, %v1722_v20  ;;  %v1732_v56 = vunpack.i.l.bf16 %v1731_v32  ;;  %vm2598_vm2 = vcmp.eq.s32.totalorder %v900_v16, 1  ;;  %v3365_v20 = vmov 0  ;;  %vm3377_vm14 = vmpackc.low %vm2541_vm5, %vm2516_vm12 }
 0x18a   : > { %v1534_v13 = vpack.c.bf16 %v831_v19, %v811_v18  ;;  %v3366_v20 = vsel %vm2598_vm2, 4294967295, %v3365_v20  ;;  %v956_v37 = vsel %vm438_vm9, 1, %v3367_v11  ;;  %v1738_v8 = vunpack.i.h.bf16 %v1736_v38  ;;  %1532 = vmatprep.subr.msk.bf16.mxu0 %vm1530_vm15, %v1531_v0 }
 0x18b   : > { %v1737_v50 = vunpack.i.l.bf16 %v1736_v38  ;;  %vm2617_vm1 = vcmp.eq.s32.totalorder %v920_v4, 1  ;;  %vm2621_vm2 = vcmp.eq.s32.totalorder %v896_v54, 1  ;;  %vm3372_vm13 = vcmask 588800  }
 0x18c   : > { %1527 = vmatmul.mubr.msk.bf16.vlgmr.msra.gmra.mrb[8].mxu1 %vm3372_vm13, %v734_v29  ;;  %vm3373_vm9 = vcmp.lt.s32.totalorder %v2104_v49, 32  ;;  %vm3375_vm3 = vcmp.lt.s32.totalorder %v2104_v49, 31  ;;  %1535 = vmatpush1.bf16.msk.msra.mxu0 %vm3377_vm14, %v1534_v13  ;;  %vm3378_vm13 = vnez %v3248_v61  ;;  %v964_v13 = vrot.slane %v956_v37, %v2108_v52 }
 0x18d   : > { %v850_v40 = vsel %vm3373_vm9, %v1727_v62, %v1728_v28  ;;  %vm3374_vm15 = vmmov %vm3373_vm9  ;;  %v870_v3 = vsel %vm3375_vm3, %v1732_v56, %v1733_v5  ;;  %1414 = vmatprep.mubr.bf16.mxu1 %v3367_v11  ;;  %vm3381_vm5 = vnez %v3281_v6  ;;  %v960_v29 = vrot.slane %v956_v37, %v2106_v51 }
 0x18e   : > { %v851_v0 = vsel %vm3374_vm15, %v1728_v28, %v1727_v62  ;;  %vm3376_vm4 = vmmov %vm3375_vm3  ;;  %v1537_v16 = vpack.c.bf16 %v870_v3, %v850_v40  ;;  %v1741_v28 = vpop.permute.xlu1 %1740  ;;  %v1756_v62 = vpop.permute.xlu0 %1755  ;;  %vm2647_vm3 = vcmp.eq.s32.totalorder %v916_v9, 1  ;;  %v3382_v36 = vsel %vm3381_vm5, %v2281_v2, -inf }
 0x18f   : > { %v871_v38 = vsel %vm3376_vm4, %v1733_v5, %v1732_v56  ;;  %v2658_v4 = vmax.f32 %v2293_v14, %v3382_v36  ;;  %v1743_v18 = vunpack.i.h.bf16 %v1741_v28  ;;  %v1742_v19 = vunpack.i.l.bf16 %v1741_v28  ;;  %vm3385_vm4 = vmpackc.low %vm2552_vm10, %vm2548_vm0 }
 0x190   : > { %v1540_v54 = vpack.c.bf16 %v871_v38, %v851_v0  ;;  %vm3383_vm12 = vcmp.lt.s32.totalorder %v2104_v49, 30  ;;  %1538 = vmatprep.subr.msk.bf16.mxu0 %vm3385_vm4, %v1537_v16  ;;  %vm3386_vm15 = vnez %v3366_v20  ;;  %v406_v14 = vadd.s32 2, %v2058_v33 }
 0x191   : > { %v890_v32 = vsel %vm3383_vm12, %v1737_v50, %v1738_v8  ;;  %vm3384_vm14 = vmmov %vm3383_vm12  ;;  %v1748_v45 = vunpack.i.h.bf16 %v2587_v42  ;;  %v1747_v58 = vunpack.i.l.bf16 %v2587_v42  ;;  %vm3388_vm10 = vcmp.lt.s32.totalorder %v2104_v49, 18 }
 0x192   : > { %v891_v9 = vsel %vm3384_vm14, %v1738_v8, %v1737_v50  ;;  %vm1542_vm9 = vmpackc.low %vm2617_vm1, %vm3386_vm15  ;;  %v910_v5 = vsel %vm3388_vm10, %v1742_v19, %v1743_v18  ;;  %v1751_v37 = vpop.permute.xlu1 %1750  ;;  %v2697_v8 = vpop.permute.xlu0 %1765  ;;  %v3393_v40 = vmov 0  ;;  %v1758_v3 = vunpack.i.h.bf16 %v1756_v62 }
 0x193   : > { %vm3387_vm12 = vmand %vm3378_vm13, %vm3338_vm8  ;;  %v1543_v33 = vpack.c.bf16 %v910_v5, %v890_v32  ;;  %v1753_v53 = vunpack.i.h.bf16 %v1751_v37  ;;  %v1752_v50 = vunpack.i.l.bf16 %v1751_v37  ;;  %v1757_v38 = vunpack.i.l.bf16 %v1756_v62 }
 0x194   : > { %v976_v2 = vsel %vm3387_vm12, 1, %v3367_v11  ;;  %vm3389_vm0 = vmmov %vm3388_vm10  ;;  %vm408_vm12 = vcmp.lt.s32.totalorder %v406_v14, 16  ;;  %vm3396_vm5 = vcmp.lt.s32.totalorder %v2104_v49, 17  ;;  %vm3405_vm15 = vcmp.lt.s32.totalorder %v2104_v49, 15 }
 0x195   : > { %v911_v56 = vsel %vm3389_vm0, %v1743_v18, %v1742_v19  ;;  %vm3390_vm14 = vmpackc.low %vm2593_vm11, %vm2556_vm7  ;;  %vm2700_vm0 = vcmp.eq.s32.totalorder %v964_v13, 1  ;;  %vm2708_vm11 = vcmp.eq.s32.totalorder %v960_v29, 1  ;;  %v984_v0 = vrot.slane %v976_v2, %v2108_v52 }
 0x196   : > { %1541 = vmatpush1.bf16.msk.msra.mxu0 %vm3390_vm14, %v1540_v54  ;;  %v1546_v42 = vpack.c.bf16 %v911_v56, %v891_v9  ;;  %v3392_v12 = vsel %vm2700_vm0, 4294967295, %v3391_v12  ;;  %v3394_v40 = vsel %vm2708_vm11, 4294967295, %v3393_v40  ;;  %vm3395_vm14 = vnez %v3262_v57  ;;  %vm3397_vm4 = vmmov %vm3396_vm5  ;;  %v1761_v13 = vpop.permute.xlu1 %1760  ;;  %v1781_v36 = vpop.permute.xlu0 %1780 }
 0x197   : > { %1544 = vmatprep.subr.msk.bf16.mxu0 %vm1542_vm9, %v1543_v33  ;;  %vm448_vm10 = vmand %vm3395_vm14, %vm2456_vm6  ;;  %vm407_vm7 = vcmp.ge.s32.totalorder %v406_v14, 0  ;;  %v929_v16 = vsel %vm3396_vm5, %v1747_v58, %v1748_v45  ;;  %v930_v54 = vsel %vm3397_vm4, %v1748_v45, %v1747_v58  ;;  %vm3398_vm11 = vcmp.lt.s32.totalorder %v2104_v49, 16 }
 0x198   : > { %v937_v7 = vsel %vm3398_vm11, %v1752_v50, %v1753_v53  ;;  %vm3399_vm0 = vmmov %vm3398_vm11  ;;  %v980_v18 = vrot.slane %v976_v2, %v2106_v51  ;;  %v1763_v29 = vunpack.i.h.bf16 %v1761_v13  ;;  %v1762_v32 = vunpack.i.l.bf16 %v1761_v13 }
 0x199   : > { %v938_v20 = vsel %vm3399_vm0, %v1753_v53, %v1752_v50  ;;  %vm3400_vm1 = vmpackc.low %vm2647_vm3, %vm2621_vm2  ;;  %v1549_v28 = vpack.c.bf16 %v937_v7, %v929_v16  ;;  %v2758_v61 = vsel %vm448_vm10, 1, %v3367_v11  ;;  %v945_v9 = vsel %vm3405_vm15, %v1757_v38, %v1758_v3 }
 0x19a   : > { %1547 = vmatpush1.bf16.msk.msra.mxu0 %vm3400_vm1, %v1546_v42  ;;  %v1552_v62 = vpack.c.bf16 %v938_v20, %v930_v54  ;;  %vm3401_vm9 = vmand %vm3378_vm13, %vm2456_vm6  ;;  %v1768_v45 = vunpack.i.h.bf16 %v2697_v8  ;;  %v1767_v57 = vunpack.i.l.bf16 %v2697_v8  ;;  %vm3407_vm5 = vnez %v3254_v21  ;;  %v1771_v33 = vpop.permute.xlu1 %1770  ;;  %v2795_v42 = vpop.permute.xlu0 %1790 }
 0x19b   : > { %v1014_v19 = vsel %vm3401_vm9, 1, %v3367_v11  ;;  %vm3402_vm2 = vmand %vm3395_vm14, %vm3338_vm8  ;;  %vm3408_vm4 = vnez %v3250_v15  ;;  %vm3411_vm0 = vnez %v3392_v12  ;;  %vm3412_vm11 = vcmp.lt.s32.totalorder %v2104_v49, 14 }
 0x19c   : > { %v1034_v43 = vsel %vm3402_vm2, 1, %v3367_v11  ;;  %vm2762_vm13 = vmand %vm407_vm7, %vm408_vm12  ;;  %vm3410_vm12 = vnez %v3260_v41  ;;  %v954_v14 = vsel %vm3412_vm11, %v1762_v32, %v1763_v29  ;;  %v1783_v5 = vunpack.i.h.bf16 %v1781_v36 }
 0x19d   : > { %vm3406_vm3 = vmmov %vm3405_vm15  ;;  %v1782_v56 = vunpack.i.l.bf16 %v1781_v36  ;;  %vm3414_vm1 = vnez %v3256_v22  ;;  %vm3415_vm9 = vnez %v3252_v17  ;;  %vm3417_vm15 = vnez %v3258_v31 }
 0x19e   : > { %v946_v2 = vsel %vm3406_vm3, %v1758_v3, %v1757_v38  ;;  %vm3409_vm10 = vmpackc.low %vm3407_vm5, %vm3408_vm4  ;;  %vm3418_vm3 = vnez %v3394_v40  ;;  %v1555_v15 = vpack.c.bf16 %v954_v14, %v945_v9  ;;  %v1773_v22 = vunpack.i.h.bf16 %v1771_v33  ;;  %v2850_v13 = vpop.permute.xlu0 %1795 }
 0x19f   : > { %1550 = vmatprep.subr.msk.bf16.mxu0 %vm3409_vm10, %v1549_v28  ;;  %vm1554_vm7 = vmpackc.low %vm3411_vm0, %vm3410_vm12  ;;  %vm2797_vm10 = vcmp.eq.s32.totalorder %v984_v0, 1  ;;  %v1772_v8 = vunpack.i.l.bf16 %v1771_v33  ;;  %v1022_v53 = vrot.slane %v1014_v19, %v2108_v52  ;;  %v1018_v50 = vrot.slane %v1014_v19, %v2106_v51 }
 0x1a0   : > { %vm3413_vm14 = vmmov %vm3412_vm11  ;;  %vm2801_vm11 = vcmp.eq.s32.totalorder %v980_v18, 1  ;;  %vm3424_vm4 = vcmp.lt.s32.totalorder %v2104_v49, 2  ;;  %v1042_v3 = vrot.slane %v1034_v43, %v2108_v52  ;;  %v1038_v38 = vrot.slane %v1034_v43, %v2106_v51 }
 0x1a1   : > { %v955_v58 = vsel %vm3413_vm14, %v1763_v29, %v1762_v32  ;;  %vm3416_vm2 = vmpackc.low %vm3414_vm1, %vm3415_vm9  ;;  %vm3423_vm9 = vnez %v3242_v44  ;;  %v974_v0 = vsel %vm3424_vm4, %v1767_v57, %v1768_v45  ;;  %v1086_v16 = vrot.slane %v2758_v61, %v2108_v52 }
 0x1a2   : > { %1553 = vmatpush1.bf16.msk.msra.mxu0 %vm3416_vm2, %v1552_v62  ;;  %vm1557_vm5 = vmpackc.low %vm3418_vm3, %vm3417_vm15  ;;  %v1558_v21 = vpack.c.bf16 %v955_v58, %v946_v2  ;;  %v975_v54 = vsel %vm3424_vm4, %v1768_v45, %v1767_v57  ;;  %vm3425_vm2 = vcmp.lt.s32.totalorder %v2104_v49, 127  ;;  %vm3426_vm12 = vcmp.lt.s32.totalorder %v2104_v49, 1  ;;  %v2848_v62 = vpop.permute.xlu1 %1775  ;;  %v2915_v45 = vpop.permute.xlu0 %1805 }
 0x1a3   : > { %vm449_vm1 = vmand %vm2762_vm13, %vm3338_vm8  ;;  %1556 = vmatprep.subr.msk.bf16.mxu0 %vm1554_vm7, %v1555_v15  ;;  %v1004_v41 = vsel %vm3425_vm2, %v1783_v5, %v1782_v56  ;;  %v993_v12 = vsel %vm3426_vm12, %v1772_v8, %v1773_v22  ;;  %vm3428_vm7 = vnez %v3264_v59  ;;  %vm3429_vm2 = vnez %v3266_v63 }
 0x1a4   : > { %vm453_vm14 = vmand %vm2762_vm13, %vm2456_vm6  ;;  %v1561_v20 = vpack.c.bf16 %v993_v12, %v974_v0  ;;  %v1098_v31 = vsel %vm449_vm1, 1, %v3367_v11  ;;  %vm2868_vm3 = vcmp.eq.s32.totalorder %v1022_v53, 1  ;;  %v1082_v25 = vrot.slane %v2758_v61, %v2106_v51 }
 0x1a5   : > { %vm3427_vm0 = vmmov %vm3426_vm12  ;;  %v2884_v44 = vsel %vm453_vm14, 1, %v3367_v11  ;;  %vm3435_vm8 = vnez %v3244_v46  ;;  %vm3436_vm1 = vcmp.lt.s32.totalorder %v2104_v49, 127  ;;  %v3437_v19 = vmax.f32 %v2025_v27, 0.0 }
 0x1a6   : > { %v994_v7 = vsel %vm3427_vm0, %v1773_v22, %v1772_v8  ;;  %1559 = vmatpush1.bf16.msk.msra.mxu0 %vm1557_vm5, %v1558_v21  ;;  %vm1560_vm4 = vmpackc.low %vm3428_vm7, %vm2797_vm10  ;;  %vm2872_vm5 = vcmp.eq.s32.totalorder %v1018_v50, 1  ;;  %v1003_v18 = vsel %vm3436_vm1, %v1782_v56, %v1783_v5  ;;  %vm2898_vm0 = vcmp.eq.s32.totalorder %v1038_v38, 1  ;;  %v1786_v2 = vpop.permute.xlu1 %1785  ;;  %v1816_v50 = vpop.permute.xlu0 %1815 }
 0x1a7   : > { %v1564_v28 = vpack.c.bf16 %v994_v7, %v975_v54  ;;  %vm1563_vm12 = vmpackc.low %vm3429_vm2, %vm2801_vm11  ;;  %v1567_v29 = vpack.c.bf16 %v1004_v41, %v3437_v19  ;;  %1562 = vmatprep.subr.msk.bf16.mxu0 %vm1560_vm4, %v1561_v20  ;;  %vm3442_vm6 = vnez %v3246_v48  ;;  %v1793_v43 = vunpack.i.h.bf16 %v2795_v42 }
 0x1a8   : > { %vm3430_vm15 = vmand %vm2762_vm13, %vm3423_vm9  ;;  %vm2894_vm9 = vcmp.eq.s32.totalorder %v1042_v3, 1  ;;  %v1792_v61 = vunpack.i.l.bf16 %v2795_v42  ;;  %v1106_v27 = vrot.slane %v1098_v31, %v2108_v52  ;;  %vm3443_vm7 = vnez %v3274_v39 }
 0x1a9   : > { %v1118_v59 = vsel %vm3430_vm15, 1, %v3367_v11  ;;  %vm451_vm10 = vmand %vm2762_vm13, %vm3435_vm8  ;;  %vm3444_vm4 = vnez %v3268_v23  ;;  %vm2923_vm14 = vcmp.eq.s32.totalorder %v1086_v16, 1  ;;  %v1102_v57 = vrot.slane %v1098_v31, %v2106_v51 }
 0x1aa   : > { %1565 = vmatpush1.bf16.msk.msra.mxu0 %vm1563_vm12, %v1564_v28  ;;  %v1126_v9 = vrot.slane %v1118_v59, %v2108_v52  ;;  %vm3445_vm15 = vmpackc.low %vm3443_vm7, %vm3444_vm4  ;;  %v1122_v14 = vrot.slane %v1118_v59, %v2106_v51  ;;  %v1186_v58 = vrot.slane %v2884_v44, %v2108_v52  ;;  %v1138_v23 = vsel %vm451_vm10, 1, %v3367_v11  ;;  %v1801_v53 = vpop.permute.xlu1 %1800  ;;  %v1826_v32 = vpop.permute.xlu0 %1825 }
 0x1ab   : > { %1568 = vmatprep.subr.msk.bf16.mxu0 %vm3445_vm15, %v1567_v29  ;;  %v3448_v39 = vmax.f32 %v2023_v26, 0.0  ;;  %v1788_v56 = vunpack.i.h.bf16 %v1786_v2  ;;  %v1787_v15 = vunpack.i.l.bf16 %v1786_v2  ;;  %vm2939_vm11 = vcmp.eq.s32.totalorder %v1082_v25, 1  ;;  %vm3451_vm2 = vmand %vm2762_vm13, %vm3442_vm6 }
 0x1ac   : > { %v1158_v33 = vsel %vm3451_vm2, 1, %v3367_v11  ;;  %v1778_v46 = vunpack.i.h.bf16 %v2848_v62  ;;  %v1777_v42 = vunpack.i.l.bf16 %v2848_v62  ;;  %v1798_v26 = vunpack.i.h.bf16 %v2850_v13  ;;  %vm1572_vm2 = vmpackc.low %vm2894_vm9, %vm2868_vm3 }
 0x1ad   : > { %v1570_v5 = vpack.c.bf16 %v1003_v18, %v3448_v39  ;;  %v1797_v37 = vunpack.i.l.bf16 %v2850_v13  ;;  %vm3452_vm12 = vcmp.lt.s32.totalorder %v2104_v49, 114  ;;  %vm3454_vm10 = vcmp.lt.s32.totalorder %v2104_v49, 126 }
 0x1ae   : > { %v1032_v17 = vsel %vm3452_vm12, %v1792_v61, %v1793_v43  ;;  %vm3453_vm8 = vmmov %vm3452_vm12  ;;  %v1012_v24 = vsel %vm3454_vm10, %v1787_v15, %v1788_v56  ;;  %vm3456_vm6 = vnez %v3276_v47  ;;  %vm3457_vm7 = vnez %v3270_v30  ;;  %v1811_v29 = vpop.permute.xlu1 %1810 }
 0x1af   : > { %v1033_v22 = vsel %vm3453_vm8, %v1793_v43, %v1792_v61  ;;  %vm3455_vm13 = vmmov %vm3454_vm10  ;;  %v1576_v8 = vpack.c.bf16 %v1032_v17, %v1012_v24  ;;  %vm2976_vm10 = vcmp.eq.s32.totalorder %v1106_v27, 1  ;;  %v1146_v0 = vrot.slane %v1138_v23, %v2108_v52 }
 0x1b0   : > { %v1013_v48 = vsel %vm3455_vm13, %v1788_v56, %v1787_v15  ;;  %vm3458_vm4 = vmpackc.low %vm3456_vm6, %vm3457_vm7  ;;  %vm2980_vm13 = vcmp.eq.s32.totalorder %v1126_v9, 1  ;;  %v1142_v3 = vrot.slane %v1138_v23, %v2106_v51  ;;  %v1803_v38 = vunpack.i.h.bf16 %v1801_v53 }
 0x1b1   : > { %1571 = vmatpush1.bf16.msk.msra.mxu0 %vm3458_vm4, %v1570_v5  ;;  %v1573_v11 = vpack.c.bf16 %v1033_v22, %v1013_v48  ;;  %vm1575_vm12 = vmpackc.low %vm2898_vm0, %vm2872_vm5  ;;  %v1802_v16 = vunpack.i.l.bf16 %v1801_v53  ;;  %vm2986_vm6 = vcmp.eq.s32.totalorder %v1102_v57, 1  ;;  %vm2990_vm7 = vcmp.eq.s32.totalorder %v1122_v14, 1 }
 0x1b2   : > { %v1166_v12 = vrot.slane %v1158_v33, %v2108_v52  ;;  %v1162_v7 = vrot.slane %v1158_v33, %v2106_v51  ;;  %vm3467_vm4 = vcmp.lt.s32.totalorder %v2104_v49, 112  ;;  %vm3469_vm15 = vcmp.lt.s32.totalorder %v2104_v49, 113 }
 0x1b3   : > { %v1336_v20 = vsel %vm3467_vm4, %v1777_v42, %v1778_v46  ;;  %vm3468_vm8 = vmmov %vm3467_vm4  ;;  %v1051_v62 = vsel %vm3469_vm15, %v1797_v37, %v1798_v26  ;;  %1574 = vmatprep.subr.msk.bf16.mxu0 %vm1572_vm2, %v1573_v11  ;;  %v1808_v31 = vunpack.i.h.bf16 %v2915_v45  ;;  %v1807_v59 = vunpack.i.l.bf16 %v2915_v45 }
 0x1b4   : > { %v1337_v28 = vsel %vm3468_vm8, %v1778_v46, %v1777_v42  ;;  %vm3470_vm1 = vmmov %vm3469_vm15  ;;  %v1059_v25 = vsel %vm3467_vm4, %v1802_v16, %v1803_v38  ;;  %vm3022_vm9 = vcmp.eq.s32.totalorder %v1146_v0, 1  ;;  %v1182_v61 = vrot.slane %v2884_v44, %v2106_v51  ;;  %v1821_v46 = vpop.permute.xlu1 %1820  ;;  %v1831_v42 = vpop.permute.xlu0 %1830  ;;  %v1850_v44 = vld [vmem:[%s3161_s7] sm:$0xff] }
 0x1b5   : > { %v1052_v13 = vsel %vm3470_vm1, %v1798_v26, %v1797_v37  ;;  %vm3471_vm8 = vmmov %vm3467_vm4  ;;  %1577 = vmatpush1.bf16.msk.msra.mxu0 %vm1575_vm12, %v1576_v8  ;;  %v1582_v19 = vpack.c.bf16 %v1059_v25, %v1051_v62  ;;  %vm3474_vm15 = vnez %v3298_v10  ;;  %vm3475_vm5 = vnez %v3296_v34  ;;  %v3491_v26 = vld [vmem:[#allocation4_spill] sm:$0xff] }
 0x1b6   : > { %v1060_v18 = vsel %vm3471_vm8, %v1803_v38, %v1802_v16  ;;  %v1338_v36 = vsel %vm3474_vm15, %v1336_v20, -inf  ;;  %v1339_v55 = vsel %vm3475_vm5, %v1337_v28, -inf  ;;  %v1813_v27 = vunpack.i.h.bf16 %v1811_v29 }
 0x1b7   : > { %v1579_v40 = vpack.c.bf16 %v1060_v18, %v1052_v13  ;;  %v1812_v9 = vunpack.i.l.bf16 %v1811_v29  ;;  %vm3032_vm0 = vcmp.eq.s32.totalorder %v1142_v3, 1  ;;  %v3476_v2 = vmov 0 }
 0x1b8   : > { %v3477_v2 = vsel %vm3032_vm0, 4294967295, %v3476_v2  ;;  %v1818_v45 = vunpack.i.h.bf16 %v1816_v50  ;;  %v1817_v57 = vunpack.i.l.bf16 %v1816_v50  ;;  %vm3478_vm2 = vnez %v3278_v1  ;;  %v1836_v3 = vpop.permute.xlu1 %1835 }
 0x1b9   : > { %vm3479_vm12 = vmpackc.low %vm3475_vm5, %vm3478_vm2  ;;  %vm3041_vm4 = vcmp.eq.s32.totalorder %v1166_v12, 1  ;;  %vm3045_vm8 = vcmp.eq.s32.totalorder %v1162_v7, 1  ;;  %v3482_v23 = vmov 0  ;;  %vm3484_vm3 = vcmp.lt.s32.totalorder %v2104_v49, 111 }
 0x1ba   : > { %1580 = vmatprep.subr.msk.bf16.mxu0 %vm3479_vm12, %v1579_v40  ;;  %v3483_v23 = vsel %vm3045_vm8, 4294967295, %v3482_v23  ;;  %v1067_v39 = vsel %vm3484_vm3, %v1807_v59, %v1808_v31  ;;  %vm3485_vm1 = vmmov %vm3484_vm3  ;;  %vm3486_vm0 = vcmp.lt.s32.totalorder %v2104_v49, 110  ;;  %vm3488_vm2 = vnez %v3281_v6 }
 0x1bb   : > { %v1068_v5 = vsel %vm3485_vm1, %v1808_v31, %v1807_v59  ;;  %v1076_v34 = vsel %vm3486_vm0, %v1812_v9, %v1813_v27  ;;  %vm3487_vm5 = vmmov %vm3486_vm0  ;;  %vm3490_vm8 = vnez %v3292_v35  ;;  %v1361_v56 = vmax.f32 %v2333_v60, %v1339_v55 }
 0x1bc   : > { %v1077_v1 = vsel %vm3487_vm5, %v1813_v27, %v1812_v9  ;;  %vm3489_vm12 = vmpackc.low %vm3474_vm15, %vm3488_vm2  ;;  %v1588_v33 = vpack.c.bf16 %v1076_v34, %v1067_v39  ;;  %vm3492_vm1 = vnez %v3491_v26  ;;  %v1360_v6 = vmax.f32 %v2658_v4, %v1338_v36  ;;  %v1841_v31 = vpop.permute.xlu1 %1840  ;;  %v3510_v36 = vld [vmem:[#allocation2_spill] sm:$0xff]  ;;  %v3511_v27 = vld [vmem:[#allocation3_spill] sm:$0xff] }
 0x1bd   : > { %1583 = vmatpush1.bf16.msk.msra.mxu0 %vm3489_vm12, %v1582_v19  ;;  %vm1584_vm3 = vmpackc.low %vm2923_vm14, %vm3490_vm8  ;;  %v1585_v15 = vpack.c.bf16 %v1077_v1, %v1068_v5  ;;  %v1823_v10 = vunpack.i.h.bf16 %v1821_v46  ;;  %v1822_v37 = vunpack.i.l.bf16 %v1821_v46  ;;  %v1833_v17 = vunpack.i.h.bf16 %v1831_v42 }
 0x1be   : > { %vm1587_vm0 = vmpackc.low %vm2939_vm11, %vm3492_vm1  ;;  %v1832_v22 = vunpack.i.l.bf16 %v1831_v42  ;;  %vm3493_vm15 = vcmp.lt.s32.totalorder %v2104_v49, 98  ;;  %v1828_v48 = vunpack.i.h.bf16 %v1826_v32  ;;  %v1827_v11 = vunpack.i.l.bf16 %v1826_v32 }
 0x1bf   : > { %v1096_v24 = vsel %vm3493_vm15, %v1817_v57, %v1818_v45  ;;  %vm3494_vm5 = vmmov %vm3493_vm15  ;;  %1586 = vmatprep.subr.msk.bf16.mxu0 %vm1584_vm3, %v1585_v15  ;;  %vm3495_vm11 = vcmp.lt.s32.totalorder %v2104_v49, 97  ;;  %vm3497_vm12 = vcmp.lt.s32.totalorder %v2104_v49, 111  ;;  %v1838_v16 = vunpack.i.h.bf16 %v1836_v3 }
 0x1c0   : > { %v1097_v60 = vsel %vm3494_vm5, %v1818_v45, %v1817_v57  ;;  %v1116_v4 = vsel %vm3495_vm11, %v1822_v37, %v1823_v10  ;;  %vm3496_vm2 = vmmov %vm3495_vm11  ;;  %v1344_v8 = vsel %vm3497_vm12, %v1832_v22, %v1833_v17  ;;  %v1837_v12 = vunpack.i.l.bf16 %v1836_v3  ;;  %v749_v57 = vpop.permute.xlu1 %748 }
 0x1c1   : > { %v1117_v21 = vsel %vm3496_vm2, %v1823_v10, %v1822_v37  ;;  %vm3498_vm15 = vmmov %vm3497_vm12  ;;  %1589 = vmatpush1.bf16.msk.msra.mxu0 %vm1587_vm0, %v1588_v33  ;;  %v1594_v50 = vpack.c.bf16 %v1116_v4, %v1096_v24  ;;  %v1346_v38 = vsel %vm3492_vm1, %v1344_v8, -inf  ;;  %vm1188_vm1 = vcmp.eq.s32.totalorder %v1186_v58, 1 }
 0x1c2   : > { %v1345_v53 = vsel %vm3498_vm15, %v1833_v17, %v1832_v22  ;;  %vm1590_vm5 = vmpackc.low %vm2980_vm13, %vm2976_vm10  ;;  %v1591_v63 = vpack.c.bf16 %v1117_v21, %v1097_v60  ;;  %v1362_v7 = vmax.f32 %v1360_v6, %v1346_v38  ;;  %vm3499_vm10 = vcmp.lt.s32.totalorder %v2104_v49, 96 }
 0x1c3   : > { %v1347_v0 = vsel %vm3490_vm8, %v1345_v53, -inf  ;;  %vm1593_vm14 = vmpackc.low %vm2990_vm7, %vm2986_vm6  ;;  %v1136_v47 = vsel %vm3499_vm10, %v1827_v11, %v1828_v48  ;;  %vm3501_vm8 = vcmp.lt.s32.totalorder %v2104_v49, 95  ;;  %vm1175_vm7 = vcmp.lt.s32.totalorder %v2104_v49, 94  ;;  %v1364_v49 = vld [vmem:[%s3163_s9] sm:$0xf] }
 0x1c4   : > { %v1363_v30 = vmax.f32 %v1361_v56, %v1347_v0  ;;  %vm3500_vm13 = vmmov %vm3499_vm10  ;;  %1592 = vmatprep.subr.msk.bf16.mxu0 %vm1590_vm5, %v1591_v63  ;;  %v1156_v54 = vsel %vm3501_vm8, %v1837_v12, %v1838_v16  ;;  %v1365_v28 = vpack.c.bf16 %v1362_v7, %v1362_v7  ;;  %vm3503_vm0 = vnez %v3477_v2  ;;  %v1371_v33 = vpop.permute.xlu1 %1370 }
 0x1c5   : > { %v1137_v35 = vsel %vm3500_vm13, %v1828_v48, %v1827_v11  ;;  %vm3502_vm3 = vmmov %vm3501_vm8  ;;  %1595 = vmatpush1.bf16.msk.msra.mxu0 %vm1593_vm14, %v1594_v50  ;;  %v1600_v13 = vpack.c.bf16 %v1156_v54, %v1136_v47  ;;  %vm3504_vm11 = vnez %v3483_v23  ;;  %v1843_v59 = vunpack.i.h.bf16 %v1841_v31 }
 0x1c6   : > { %v1157_v41 = vsel %vm3502_vm3, %v1838_v16, %v1837_v12  ;;  %v1366_v20 = vpack.c.bf16 %v1363_v30, %v1363_v30  ;;  %vm1596_vm6 = vmpackc.low %vm3041_vm4, %vm3022_vm9  ;;  %v1842_v25 = vunpack.i.l.bf16 %v1841_v31  ;;  %vm3505_vm12 = vcmask 1041408  }
 0x1c7   : > { %v1597_v62 = vpack.c.bf16 %v1157_v41, %v1137_v35  ;;  %vm1599_vm2 = vmpackc.low %vm3504_vm11, %vm3503_vm0  ;;  %vm1187_vm4 = vcmp.eq.s32.totalorder %v1182_v61, 1  ;;  %vm3507_vm15 = vcmask 31744   ;;  %vm3508_vm5 = vcmask 1043456   ;;  %v468_v61 = vpop.permute.xlu0 %467 }
 0x1c8   : > { %1604 = vmatprep.subr.msk.bf16.mxu1 %vm3505_vm12, %v1366_v20  ;;  %vm3506_vm9 = vmmov %vm3505_vm12  ;;  %v1177_v52 = vsel %vm1175_vm7, %v1843_v59, %v1842_v25  ;;  %v1176_v58 = vsel %vm1175_vm7, %v1842_v25, %v1843_v59  ;;  %v1528_v43 = vcombine.low %v1850_v44, %v1850_v44  ;;  %v537_v55 = vadd.f32 %v3510_v36, %v468_v61 }
 0x1c9   : > { %v1377_v18 = vsel %vm3506_vm9, %v1365_v28, 0  ;;  %1598 = vmatprep.subr.msk.bf16.mxu0 %vm1596_vm6, %v1597_v62  ;;  %v1190_v40 = vsel %vm1188_vm1, %v1177_v52, 0.0  ;;  %v1189_v19 = vsel %vm1187_vm4, %v1176_v58, 0.0  ;;  %vm3509_vm14 = vmmov %vm3508_vm5  ;;  %v539_v9 = vadd.f32 %v3511_v27, %v468_v61 }
 0x1ca   : > { %1383 = vmatpush1.bf16.msra.mxu1 %v1377_v18  ;;  %1601 = vmatpush1.bf16.msk.msra.mxu0 %vm1599_vm2, %v1600_v13  ;;  %v1217_v29 = vpack.c.bf16 %v1190_v40, %v1190_v40  ;;  %v1216_v32 = vpack.c.bf16 %v1189_v19, %v1189_v19  ;;  %v553_v2 = vmax.f32 %v537_v55, 0.0 }
 0x1cb   : > { %v554_v45 = vmax.f32 %v539_v9, 0.0  ;;  %v1222_v24 = vpop.permute.xlu0 %1221 }
 0x1cc   : > { %1602 = vmatprep.subr.msk.bf16.mxu0 %vm3508_vm5, %v1217_v29  ;;  %v1234_v51 = vsel %vm3509_vm14, %v1216_v32, 0  ;;  %1425 = vst [vmem:[%s3141_s28] sm:$0xff] %v553_v2 }
 0x1cd   : > { %1605 = vmatmul.mubr.msk.bf16.vlgmr.msra.gmra.mrb[12].mxu1 %vm3507_vm15, %v1364_v49  ;;  %1426 = vst [vmem:[%s3141_s28 + $0x8] sm:$0xff] %v554_v45 }
 0x1ce   : > { %1264 = vmatpush1.bf16.msra.mxu0 %v1234_v51 }
 0x1d1   : > { %1272 = vmatmul.mubr.bf16.vlgmr.msra.gmra.mrb[0].mxu0 %v1528_v43 }
 0x25f   : > { %v796_v14 = vpop.f32.mrb[8].mxu1 }
 0x260   : > { %v798_v23 = vpop.f32.mrb[9].mxu1  ;;  %v797_v39 = vadd.f32 %v796_v14, %v749_v57 }
 0x261   : > { %v800_v5 = vpop.f32.mrb[10].mxu1  ;;  %v799_v34 = vadd.f32 %v798_v23, %v749_v57 }
 0x262   : > { %v803_v1 = vmax.f32 %v797_v39, 0.0  ;;  %v801_v56 = vpop.f32.mrb[11].mxu1 }
 0x263   : > { %v804_v15 = vmax.f32 %v799_v34, 0.0 }
 0x264   : > { %1427 = vst [vmem:[%s3141_s28 + $0x10] sm:$0xff] %v803_v1 }
 0x265   : > { %1428 = vst [vmem:[%s3141_s28 + $0x18] sm:$0xff] %v804_v15 }
 0x2a0   : > { %v1416_v46 = vpop.f32.mrb[12].mxu1 }
 0x2a1   : > { %v1417_v42 = vadd.f32 %v1416_v46, %v1371_v33  ;;  %v1418_v26 = vpop.f32.mrb[13].mxu1 }
 0x2a2   : > { %v1419_v6 = vadd.f32 %v1418_v26, %v1371_v33  ;;  %v1420_v10 = vpop.f32.mrb[14].mxu1 }
 0x2a3   : > { %v1423_v37 = vmax.f32 %v1417_v42, 0.0  ;;  %v1421_v17 = vpop.f32.mrb[15].mxu1 }
 0x2a4   : > { %v1424_v22 = vmax.f32 %v1419_v6, 0.0  ;;  %v1273_v60 = vpop.f32.mrb[0].mxu0 }
 0x2a5   : > { %1431 = vst [vmem:[%s3141_s28 + $0x30] sm:$0xff] %v1423_v37  ;;  %v1274_v48 = vadd.f32 %v1273_v60, %v1222_v24  ;;  %v1275_v11 = vpop.f32.mrb[1].mxu0 }
 0x2a6   : > { %1432 = vst [vmem:[%s3141_s28 + $0x38] sm:$0xff] %v1424_v22  ;;  %v1276_v4 = vadd.f32 %v1275_v11, %v1222_v24  ;;  %v1277_v21 = vpop.f32.mrb[2].mxu0 }
 0x2a7   : > { %v1280_v8 = vmax.f32 %v1274_v48, 0.0  ;;  %v1278_v53 = vpop.f32.mrb[3].mxu0 }
 0x2a8   : > { %v1281_v63 = vmax.f32 %v1276_v4, 0.0 }
 0x2a9   : > { %1429 = vst [vmem:[%s3141_s28 + $0x20] sm:$0xff] %v1280_v8 }
 0x2aa   : > { %1430 = vst [vmem:[%s3141_s28 + $0x28] sm:$0xff] %v1281_v63 }
 0x2ab PF: > { %s21_s17 = sadd.s32 1, %s1857_s17  }
 0x2ac   : > { %p18_p4 = scmp.ge.s32.totalorder %s21_s17, 4  }
 0x2ae   :  { %20 = sbr.rel (!%p18_p4) target bundleno = 1 (0x1), region = 94 }

</bundles_post_ra>
